<compile_context>
chip_gen: v7x
topology: tpu7x:2x2x1
jax: 0.10.0
libtpu: 0.0.40
codegen_flags: <defaults>
</compile_context>

<pallas_src>
import functools

import jax
import jax.numpy as jnp
from jax.experimental import pallas as pl
from jax.experimental.pallas import tpu as pltpu

C_IN = 1088
C1, C2, C3 = 512, 256, 128
K_PAD = 128            # lane-dense padded class dimension
BN_EPS = 1e-5
NEG_INF = -1e30        # bias padding for fake classes (exp underflows to 0)


def _global_tirnn_kernel(x_ref,
                         w1_ref, b1_ref,
                         w2_ref, b2_ref,
                         w3_ref, b3_ref,
                         w4_ref, b4_ref,
                         o_ref):
    """Fused (conv1x1+BN+ReLU) x3 -> conv1x1 -> log_softmax for one row tile.

    Matmuls take bf16 operands on the MXU with f32 accumulation; bias, ReLU and
    log_softmax run in f32.  The class axis is padded to 128 lanes with -1e30
    biases so the output store is lane-dense and the lse is exact.
    """
    x = x_ref[...]                                                   # (tm, 1088) bf16

    h = jnp.dot(x, w1_ref[...], preferred_element_type=jnp.float32) + b1_ref[...]
    h = jnp.maximum(h, 0.0).astype(jnp.bfloat16)                     # (tm, 512)

    h = jnp.dot(h, w2_ref[...], preferred_element_type=jnp.float32) + b2_ref[...]
    h = jnp.maximum(h, 0.0).astype(jnp.bfloat16)                     # (tm, 256)

    h = jnp.dot(h, w3_ref[...], preferred_element_type=jnp.float32) + b3_ref[...]
    h = jnp.maximum(h, 0.0).astype(jnp.bfloat16)                     # (tm, 128)

    logits = jnp.dot(h, w4_ref[...], preferred_element_type=jnp.float32) + b4_ref[...]
    # log_softmax over the padded class axis; padded columns carry -1e30 biases
    # so exp() is exactly 0 there and the normalizer is untouched.
    z = logits - jnp.max(logits, axis=-1, keepdims=True)
    lse = jnp.log(jnp.sum(jnp.exp(z), axis=-1, keepdims=True))
    o_ref[...] = (z - lse).astype(o_ref.dtype)


def _round_up(x, m):
    return (x + m - 1) // m * m


@functools.partial(jax.jit, static_argnames=("k", "tm"))
def global_tirnn_forward(x, params, *, k, tm=512):
    """x: (B, 1088, N) float32  ->  (B, N, k) float32 log-probs."""
    B, cin, N = x.shape
    assert cin == C_IN
    assert k <= K_PAD
    M = B * N

    # NCW -> (M, Cin) rows-of-points layout (glue, not the hot path).
    x_rows = jnp.transpose(x, (0, 2, 1)).reshape(M, C_IN)

    # Row tile: large enough to feed the MXU and amortize per-grid-step
    # overhead; clamped for tiny inputs.  Rows are zero-padded so the grid
    # divides evenly (padded rows are sliced off after the call).
    tm_eff = min(tm, _round_up(M, 8))
    m_pad = _round_up(M, tm_eff)
    if m_pad != M:
        x_rows = jnp.pad(x_rows, ((0, m_pad - M), (0, 0)))

    # bf16 operands for the MXU (f32 accumulation inside the kernel).
    x_bf16 = x_rows.astype(jnp.bfloat16)

    (w1, b1), (w2, b2), (w3, b3), (w4, b4) = params
    w1b, w2b, w3b = (w.astype(jnp.bfloat16) for w in (w1, w2, w3))
    # Pad the final layer to a lane-dense 128-wide block: zero weights and
    # -1e30 bias on the padded classes keep log_softmax exactly correct.
    w4p = jnp.zeros((C3, K_PAD), jnp.float32).at[:, :k].set(w4).astype(jnp.bfloat16)
    b4p = jnp.full((1, K_PAD), NEG_INF, jnp.float32).at[:, :k].set(b4)

    grid = (m_pad // tm_eff,)

    def w_spec(cin_, cout_):
        return pl.BlockSpec((cin_, cout_), lambda i: (0, 0))

    def b_spec(cout_):
        return pl.BlockSpec((1, cout_), lambda i: (0, 0))

    mm_terms = C_IN * C1 + C1 * C2 + C2 * C3 + C3 * K_PAD
    cost = pl.CostEstimate(
        flops=2 * m_pad * mm_terms,
        transcendentals=m_pad * (K_PAD + 1),
        bytes_accessed=(m_pad * C_IN * 2 + m_pad * K_PAD * 4
                        + 2 * mm_terms + 4 * (C1 + C2 + C3 + K_PAD)),
    )

    out = pl.pallas_call(
        _global_tirnn_kernel,
        out_shape=jax.ShapeDtypeStruct((m_pad, K_PAD), jnp.float32),
        grid_spec=pltpu.PrefetchScalarGridSpec(
            num_scalar_prefetch=0,
            grid=grid,
            in_specs=[
                pl.BlockSpec((tm_eff, C_IN), lambda i: (i, 0)),
                w_spec(C_IN, C1), b_spec(C1),
                w_spec(C1, C2), b_spec(C2),
                w_spec(C2, C3), b_spec(C3),
                w_spec(C3, K_PAD), b_spec(K_PAD),
            ],
            out_specs=pl.BlockSpec((tm_eff, K_PAD), lambda i: (i, 0)),
        ),
        compiler_params=pltpu.CompilerParams(
            dimension_semantics=("parallel",),
            # Explicit scoped-VMEM ceiling: safe on v5e (16 MiB default),
            # v6e (32 MiB default / 128 MiB physical) and v7x (64 MiB physical).
            vmem_limit_bytes=48 * 1024 * 1024,
        ),
        cost_estimate=cost,
    )(x_bf16, w1b, b1, w2b, b2, w3b, b3, w4p, b4p)

    return out[:M, :k].reshape(B, N, k)


def init_params(key, k):
    """Deterministic parameter init; BN (eval mode) folded into conv weight/bias."""
    dims = [(C_IN, C1), (C1, C2), (C2, C3), (C3, k)]
    keys = jax.random.split(key, 2 * len(dims))
    params = []
    for li, (cin, cout) in enumerate(dims):
        kw, kb = keys[2 * li], keys[2 * li + 1]
        bound = 1.0 / jnp.sqrt(cin)
        # stored transposed: (cin, cout) so the kernel does x @ w
        w = jax.random.uniform(kw, (cin, cout), jnp.float32, -bound, bound)
        b = jax.random.uniform(kb, (1, cout), jnp.float32, -bound, bound)
        if li < 3:
            # BatchNorm1d eval mode with default buffers/affine:
            # gamma=1, beta=0, running_mean=0, running_var=1
            gamma = jnp.ones((cout,), jnp.float32)
            beta = jnp.zeros((cout,), jnp.float32)
            running_mean = jnp.zeros((cout,), jnp.float32)
            running_var = jnp.ones((cout,), jnp.float32)
            scale = gamma / jnp.sqrt(running_var + BN_EPS)
            shift = beta - running_mean * scale
            w = w * scale[None, :]
            b = b * scale[None, :] + shift[None, :]
        params.append((w, b))
    return tuple(params)


def reference_forward(x, params, k):
    """Pure-JAX f32 reference of the same math (sanity check)."""
    B, _, N = x.shape
    h = jnp.transpose(x, (0, 2, 1)).reshape(B * N, C_IN)
    for li, (w, b) in enumerate(params):
        h = h @ w + b
        if li < 3:
            h = jnp.maximum(h, 0.0)
    h = jax.nn.log_softmax(h, axis=-1)
    return h.reshape(B, N, k)


def reference_forward_bf16(x, params, k):
    """Reference matching the kernel's precision (bf16 operands, f32 accum)."""
    B, _, N = x.shape
    h = jnp.transpose(x, (0, 2, 1)).reshape(B * N, C_IN).astype(jnp.bfloat16)
    for li, (w, b) in enumerate(params):
        h = jnp.dot(h, w.astype(jnp.bfloat16),
                    preferred_element_type=jnp.float32) + b
        if li < 3:
            h = jnp.maximum(h, 0.0).astype(jnp.bfloat16)
    h = jax.nn.log_softmax(h, axis=-1)
    return h.reshape(B, N, k)


if __name__ == "__main__":
    key = jax.random.PRNGKey(0)
    k_params, k_x = jax.random.split(key)

    K = 6          # number of classes (module default k=6)
    B = 2          # batch
    N = 16         # points per cloud

    params = init_params(k_params, K)
    x = jax.random.normal(k_x, (B, C_IN, N), jnp.float32)

    out = global_tirnn_forward(x, params, k=K, tm=512)
    out = jax.block_until_ready(out)
    assert out.shape == (B, N, K)

    # Tight check against a precision-matched (bf16 operand / f32 acc) reference,
    # loose check against the full-f32 reference.
    ref_bf16 = reference_forward_bf16(x, params, K)
    ref_f32 = reference_forward(x, params, K)
    assert jnp.max(jnp.abs(out - ref_bf16)) < 2e-3
    assert jnp.max(jnp.abs(out - ref_f32)) < 5e-2

    print("KERNEL_OK")
</pallas_src>

<mosaic_0001>
module attributes {stable_mosaic.version = 11 : i64} {
  func.func @_global_tirnn_kernel(%arg0: i32, %arg1: memref<32x1088xbf16, #tpu.memory_space<vmem>>, %arg2: memref<1088x512xbf16, #tpu.memory_space<vmem>>, %arg3: memref<1x512xf32, #tpu.memory_space<vmem>>, %arg4: memref<512x256xbf16, #tpu.memory_space<vmem>>, %arg5: memref<1x256xf32, #tpu.memory_space<vmem>>, %arg6: memref<256x128xbf16, #tpu.memory_space<vmem>>, %arg7: memref<1x128xf32, #tpu.memory_space<vmem>>, %arg8: memref<128x128xbf16, #tpu.memory_space<vmem>>, %arg9: memref<1x128xf32, #tpu.memory_space<vmem>>, %arg10: memref<32x128xf32, #tpu.memory_space<vmem>>) attributes {dimension_semantics = [#tpu.dimension_semantics<parallel>], iteration_bounds = array<i64: 1>, scalar_prefetch = 0 : i64, scratch_operands = 0 : i64, tpu.core_type = #tpu.core_type<tc>, window_params = [{transform_indices = @transform_0, window_bounds = array<i64: 32, 1088>}, {pipeline_mode = #tpu.pipeline_mode<synchronous>, transform_indices = @transform_1, window_bounds = array<i64: 1088, 512>}, {pipeline_mode = #tpu.pipeline_mode<synchronous>, transform_indices = @transform_2, window_bounds = array<i64: 1, 512>}, {pipeline_mode = #tpu.pipeline_mode<synchronous>, transform_indices = @transform_3, window_bounds = array<i64: 512, 256>}, {pipeline_mode = #tpu.pipeline_mode<synchronous>, transform_indices = @transform_4, window_bounds = array<i64: 1, 256>}, {pipeline_mode = #tpu.pipeline_mode<synchronous>, transform_indices = @transform_5, window_bounds = array<i64: 256, 128>}, {pipeline_mode = #tpu.pipeline_mode<synchronous>, transform_indices = @transform_6, window_bounds = array<i64: 1, 128>}, {pipeline_mode = #tpu.pipeline_mode<synchronous>, transform_indices = @transform_7, window_bounds = array<i64: 128, 128>}, {pipeline_mode = #tpu.pipeline_mode<synchronous>, transform_indices = @transform_8, window_bounds = array<i64: 1, 128>}, {transform_indices = @transform_9, window_bounds = array<i64: 32, 128>}]} {
    %c0 = arith.constant 0 : index
    %c0_0 = arith.constant 0 : index
    %0 = vector.load %arg1[%c0, %c0_0] : memref<32x1088xbf16, #tpu.memory_space<vmem>>, vector<32x1088xbf16>
    %c0_1 = arith.constant 0 : index
    %c0_2 = arith.constant 0 : index
    %1 = vector.load %arg2[%c0_1, %c0_2] : memref<1088x512xbf16, #tpu.memory_space<vmem>>, vector<1088x512xbf16>
    %cst = arith.constant dense<0.000000e+00> : vector<32x512xf32>
    %2 = tpu.matmul %0, %1, %cst {dimension_numbers = #tpu.dot_dimension_numbers<[1], [0], [0], [1], [0, 0, 1, 1], [], []>} : vector<32x1088xbf16>, vector<1088x512xbf16>, vector<32x512xf32> -> vector<32x512xf32>
    %c0_3 = arith.constant 0 : index
    %c0_4 = arith.constant 0 : index
    %3 = vector.load %arg3[%c0_3, %c0_4] : memref<1x512xf32, #tpu.memory_space<vmem>>, vector<1x512xf32>
    %4 = vector.broadcast %3 : vector<1x512xf32> to vector<32x512xf32>
    %5 = arith.addf %2, %4 : vector<32x512xf32>
    %cst_5 = arith.constant 0.000000e+00 : f32
    %6 = vector.broadcast %cst_5 : f32 to vector<32x512xf32>
    %7 = arith.maximumf %5, %6 : vector<32x512xf32>
    %8 = arith.truncf %7 : vector<32x512xf32> to vector<32x512xbf16>
    %c0_6 = arith.constant 0 : index
    %c0_7 = arith.constant 0 : index
    %9 = vector.load %arg4[%c0_6, %c0_7] : memref<512x256xbf16, #tpu.memory_space<vmem>>, vector<512x256xbf16>
    %cst_8 = arith.constant dense<0.000000e+00> : vector<32x256xf32>
    %10 = tpu.matmul %8, %9, %cst_8 {dimension_numbers = #tpu.dot_dimension_numbers<[1], [0], [0], [1], [0, 0, 1, 1], [], []>} : vector<32x512xbf16>, vector<512x256xbf16>, vector<32x256xf32> -> vector<32x256xf32>
    %c0_9 = arith.constant 0 : index
    %c0_10 = arith.constant 0 : index
    %11 = vector.load %arg5[%c0_9, %c0_10] : memref<1x256xf32, #tpu.memory_space<vmem>>, vector<1x256xf32>
    %12 = vector.broadcast %11 : vector<1x256xf32> to vector<32x256xf32>
    %13 = arith.addf %10, %12 : vector<32x256xf32>
    %cst_11 = arith.constant 0.000000e+00 : f32
    %14 = vector.broadcast %cst_11 : f32 to vector<32x256xf32>
    %15 = arith.maximumf %13, %14 : vector<32x256xf32>
    %16 = arith.truncf %15 : vector<32x256xf32> to vector<32x256xbf16>
    %c0_12 = arith.constant 0 : index
    %c0_13 = arith.constant 0 : index
    %17 = vector.load %arg6[%c0_12, %c0_13] : memref<256x128xbf16, #tpu.memory_space<vmem>>, vector<256x128xbf16>
    %cst_14 = arith.constant dense<0.000000e+00> : vector<32x128xf32>
    %18 = tpu.matmul %16, %17, %cst_14 {dimension_numbers = #tpu.dot_dimension_numbers<[1], [0], [0], [1], [0, 0, 1, 1], [], []>} : vector<32x256xbf16>, vector<256x128xbf16>, vector<32x128xf32> -> vector<32x128xf32>
    %c0_15 = arith.constant 0 : index
    %c0_16 = arith.constant 0 : index
    %19 = vector.load %arg7[%c0_15, %c0_16] : memref<1x128xf32, #tpu.memory_space<vmem>>, vector<1x128xf32>
    %20 = vector.broadcast %19 : vector<1x128xf32> to vector<32x128xf32>
    %21 = arith.addf %18, %20 : vector<32x128xf32>
    %cst_17 = arith.constant 0.000000e+00 : f32
    %22 = vector.broadcast %cst_17 : f32 to vector<32x128xf32>
    %23 = arith.maximumf %21, %22 : vector<32x128xf32>
    %24 = arith.truncf %23 : vector<32x128xf32> to vector<32x128xbf16>
    %c0_18 = arith.constant 0 : index
    %c0_19 = arith.constant 0 : index
    %25 = vector.load %arg8[%c0_18, %c0_19] : memref<128x128xbf16, #tpu.memory_space<vmem>>, vector<128x128xbf16>
    %cst_20 = arith.constant dense<0.000000e+00> : vector<32x128xf32>
    %26 = tpu.matmul %24, %25, %cst_20 {dimension_numbers = #tpu.dot_dimension_numbers<[1], [0], [0], [1], [0, 0, 1, 1], [], []>} : vector<32x128xbf16>, vector<128x128xbf16>, vector<32x128xf32> -> vector<32x128xf32>
    %c0_21 = arith.constant 0 : index
    %c0_22 = arith.constant 0 : index
    %27 = vector.load %arg9[%c0_21, %c0_22] : memref<1x128xf32, #tpu.memory_space<vmem>>, vector<1x128xf32>
    %28 = vector.broadcast %27 : vector<1x128xf32> to vector<32x128xf32>
    %29 = arith.addf %26, %28 : vector<32x128xf32>
    %cst_23 = arith.constant dense<0xFF800000> : vector<32xf32>
    %30 = vector.multi_reduction <maximumf>, %29, %cst_23 [1] : vector<32x128xf32> to vector<32xf32>
    %31 = vector.shape_cast %30 : vector<32xf32> to vector<32x1xf32>
    %32 = vector.broadcast %31 : vector<32x1xf32> to vector<32x128xf32>
    %33 = arith.subf %29, %32 : vector<32x128xf32>
    %34 = math.exp %33 : vector<32x128xf32>
    %cst_24 = arith.constant dense<0.000000e+00> : vector<32xf32>
    %35 = vector.multi_reduction <add>, %34, %cst_24 [1] : vector<32x128xf32> to vector<32xf32>
    %36 = vector.shape_cast %35 : vector<32xf32> to vector<32x1xf32>
    %37 = math.log %36 : vector<32x1xf32>
    %38 = vector.broadcast %37 : vector<32x1xf32> to vector<32x128xf32>
    %39 = arith.subf %33, %38 : vector<32x128xf32>
    %c0_25 = arith.constant 0 : index
    %c0_26 = arith.constant 0 : index
    %40 = vector.load %arg10[%c0_25, %c0_26] : memref<32x128xf32, #tpu.memory_space<vmem>>, vector<32x128xf32>
    tpu.vector_store %arg10[%c0_25, %c0_26], %39 {strides = array<i32>} : memref<32x128xf32, #tpu.memory_space<vmem>>, vector<32x128xf32>,
    return
  }
  func.func @transform_0(%arg0: i32) -> (i32, i32) {
    %c0_i32 = arith.constant 0 : i32
    %c0_i32_0 = arith.constant 0 : i32
    return %arg0, %c0_i32 : i32, i32
  }
  func.func @transform_1(%arg0: i32) -> (i32, i32) {
    %c0_i32 = arith.constant 0 : i32
    %c0_i32_0 = arith.constant 0 : i32
    %c0_i32_1 = arith.constant 0 : i32
    return %c0_i32, %c0_i32_0 : i32, i32
  }
  func.func @transform_2(%arg0: i32) -> (i32, i32) {
    %c0_i32 = arith.constant 0 : i32
    %c0_i32_0 = arith.constant 0 : i32
    %c0_i32_1 = arith.constant 0 : i32
    return %c0_i32, %c0_i32_0 : i32, i32
  }
  func.func @transform_3(%arg0: i32) -> (i32, i32) {
    %c0_i32 = arith.constant 0 : i32
    %c0_i32_0 = arith.constant 0 : i32
    %c0_i32_1 = arith.constant 0 : i32
    return %c0_i32, %c0_i32_0 : i32, i32
  }
  func.func @transform_4(%arg0: i32) -> (i32, i32) {
    %c0_i32 = arith.constant 0 : i32
    %c0_i32_0 = arith.constant 0 : i32
    %c0_i32_1 = arith.constant 0 : i32
    return %c0_i32, %c0_i32_0 : i32, i32
  }
  func.func @transform_5(%arg0: i32) -> (i32, i32) {
    %c0_i32 = arith.constant 0 : i32
    %c0_i32_0 = arith.constant 0 : i32
    %c0_i32_1 = arith.constant 0 : i32
    return %c0_i32, %c0_i32_0 : i32, i32
  }
  func.func @transform_6(%arg0: i32) -> (i32, i32) {
    %c0_i32 = arith.constant 0 : i32
    %c0_i32_0 = arith.constant 0 : i32
    %c0_i32_1 = arith.constant 0 : i32
    return %c0_i32, %c0_i32_0 : i32, i32
  }
  func.func @transform_7(%arg0: i32) -> (i32, i32) {
    %c0_i32 = arith.constant 0 : i32
    %c0_i32_0 = arith.constant 0 : i32
    %c0_i32_1 = arith.constant 0 : i32
    return %c0_i32, %c0_i32_0 : i32, i32
  }
  func.func @transform_8(%arg0: i32) -> (i32, i32) {
    %c0_i32 = arith.constant 0 : i32
    %c0_i32_0 = arith.constant 0 : i32
    %c0_i32_1 = arith.constant 0 : i32
    return %c0_i32, %c0_i32_0 : i32, i32
  }
  func.func @transform_9(%arg0: i32) -> (i32, i32) {
    %c0_i32 = arith.constant 0 : i32
    %c0_i32_0 = arith.constant 0 : i32
    return %arg0, %c0_i32 : i32, i32
  }
}

</mosaic_0001>

<bundles_post_ra>
// kernel: global_tirnn_forward.1
= control target key start
LH: loop header
LB: loop body
LE: loop exit
PB: predicated region body
PF: predicated region fallthrough
CT: control target
= control target key end

     0   :  { %v4341_v1 = vmov 0   ;;  %vm1797_vm0 = vcmask 523264   ;;  %s5608_s1 = inlined_call_operand.vmem [shape: bf16[1088,512], index: 1, kind: input, shape index: {}]   ;;  %s5609_s0 = inlined_call_operand.vmem [shape: bf16[32,1088], index: 0, kind: input, shape index: {}]   ;;  %s5610_s3 = inlined_call_operand.vmem [shape: bf16[512,256], index: 3, kind: input, shape index: {}]   ;;  %s5611_s5 = inlined_call_operand.vmem [shape: bf16[256,128], index: 5, kind: input, shape index: {}]   ;;  %s5612_s2 = inlined_call_operand.vmem [shape: f32[1,512], index: 2, kind: input, shape index: {}]   ;;  %s5613_s7 = inlined_call_operand.vmem [shape: bf16[128,128], index: 7, kind: input, shape index: {}]   ;;  %s5614_s4 = inlined_call_operand.vmem [shape: f32[1,256], index: 4, kind: input, shape index: {}]   ;;  %s5615_s6 = inlined_call_operand.vmem [shape: f32[1,128], index: 6, kind: input, shape index: {}]   ;;  %s5616_s8 = inlined_call_operand.vmem [shape: f32[1,128], index: 8, kind: input, shape index: {}]   ;;  %s5617_s9 = inlined_call_operand.vmem [shape: f32[32,128], index: 9, kind: output, shape index: {}]  }
   0x1   :  { %v3769_v0 = vld [vmem:[%s5608_s1 + $0x4] ss:$16 sps:$4 sm:$0xff]   ;;  %2048 = vmatprep.mubr.bf16.mxu1 %v4341_v1  ;;  %v3773_v3 = vld [vmem:[%s5608_s1] ss:$16 sps:$4 sm:$0xff]   ;;  %v3797_v18 = vld [vmem:[%s5608_s1 + $0xc] ss:$16 sps:$4 sm:$0xff]  }
   0x2   :  { %v3771_v2 = vld [vmem:[%s5608_s1 + $0x804] ss:$16 sps:$4 sm:$0xff]   ;;  %1804 = vmatprep.subr.bf16.mxu0 %v3769_v0  ;;  %v3774_v4 = vld [vmem:[%s5608_s1 + $0x800] ss:$16 sps:$4 sm:$0xff]   ;;  %v3795_v20 = vld [vmem:[%s5608_s1 + $0x8] ss:$16 sps:$4 sm:$0xff]  }
   0x3   :  { %2016 = vmatprep.subr.bf16.mxu1 %v3771_v2  ;;  %v3775_v5 = vld [vmem:[%s5608_s1 + $0x24] ss:$16 sps:$4 sm:$0xff]   ;;  %1805 = vmatpush1.bf16.msra.mxu0 %v3773_v3  ;;  %v3779_v7 = vld [vmem:[%s5608_s1 + $0x20] ss:$16 sps:$4 sm:$0xff]   ;;  %v3804_v23 = vld [vmem:[%s5608_s1 + $0x2c] ss:$16 sps:$4 sm:$0xff]  }
   0x4   :  { %2017 = vmatpush1.bf16.msra.mxu1 %v3774_v4  ;;  %v3777_v6 = vld [vmem:[%s5608_s1 + $0x824] ss:$16 sps:$4 sm:$0xff]   ;;  %1806 = vmatprep.subr.bf16.mxu0 %v3775_v5  ;;  %v3780_v8 = vld [vmem:[%s5608_s1 + $0x820] ss:$16 sps:$4 sm:$0xff]   ;;  %v3802_v24 = vld [vmem:[%s5608_s1 + $0x28] ss:$16 sps:$4 sm:$0xff]  }
   0x5   :  { %2018 = vmatprep.subr.bf16.mxu1 %v3777_v6  ;;  %v3781_v9 = vld [vmem:[%s5608_s1 + $0x44] ss:$16 sps:$4 sm:$0xff]   ;;  %v3785_v11 = vld [vmem:[%s5608_s1 + $0x40] ss:$16 sps:$4 sm:$0xff]   ;;  %v3810_v27 = vld [vmem:[%s5608_s1 + $0x4c] ss:$16 sps:$4 sm:$0xff]  }
   0x6   :  { %v3783_v10 = vld [vmem:[%s5608_s1 + $0x844] ss:$16 sps:$4 sm:$0xff]   ;;  %v3786_v12 = vld [vmem:[%s5608_s1 + $0x840] ss:$16 sps:$4 sm:$0xff]   ;;  %v3808_v28 = vld [vmem:[%s5608_s1 + $0x48] ss:$16 sps:$4 sm:$0xff]  }
   0x7   :  { %1807 = vmatpush1.bf16.msra.mxu0 %v3779_v7  ;;  %v3787_v13 = vld [vmem:[%s5608_s1 + $0x64] ss:$16 sps:$4 sm:$0xff]   ;;  %v3791_v15 = vld [vmem:[%s5608_s1 + $0x60] ss:$16 sps:$4 sm:$0xff]   ;;  %v3816_v31 = vld [vmem:[%s5608_s1 + $0x6c] ss:$16 sps:$4 sm:$0xff]  }
   0x8   :  { %2019 = vmatpush1.bf16.msra.mxu1 %v3780_v8  ;;  %1808 = vmatprep.subr.bf16.mxu0 %v3781_v9  ;;  %v3789_v14 = vld [vmem:[%s5608_s1 + $0x864] ss:$16 sps:$4 sm:$0xff]   ;;  %v3792_v16 = vld [vmem:[%s5608_s1 + $0x860] ss:$16 sps:$4 sm:$0xff]   ;;  %v3814_v32 = vld [vmem:[%s5608_s1 + $0x68] ss:$16 sps:$4 sm:$0xff]  }
   0x9   :  { %2020 = vmatprep.subr.bf16.mxu1 %v3783_v10  ;;  %v3793_v17 = vld [vmem:[%s5608_s1 + $0x84] ss:$16 sps:$4 sm:$0xff]   ;;  %v3798_v21 = vld [vmem:[%s5608_s1 + $0x80] ss:$16 sps:$4 sm:$0xff]   ;;  %v3822_v35 = vld [vmem:[%s5608_s1 + $0x8c] ss:$16 sps:$4 sm:$0xff]  }
   0xa   :  { %v3799_v19 = vld [vmem:[%s5609_s0 + $0x20] ss:$36 sps:$4 sm:$0xff]   ;;  %v3820_v36 = vld [vmem:[%s5608_s1 + $0x88] ss:$16 sps:$4 sm:$0xff]   ;;  %v3828_v39 = vld [vmem:[%s5608_s1 + $0xac] ss:$16 sps:$4 sm:$0xff]  }
   0xb   :  { %1809 = vmatpush1.bf16.msra.mxu0 %v3785_v11  ;;  %v3800_v22 = vld [vmem:[%s5608_s1 + $0xa4] ss:$16 sps:$4 sm:$0xff]   ;;  %v3805_v25 = vld [vmem:[%s5608_s1 + $0xa0] ss:$16 sps:$4 sm:$0xff]   ;;  %v3826_v40 = vld [vmem:[%s5608_s1 + $0xa8] ss:$16 sps:$4 sm:$0xff]  }
   0xc   :  { %2021 = vmatpush1.bf16.msra.mxu1 %v3786_v12  ;;  %1810 = vmatprep.subr.bf16.mxu0 %v3787_v13  ;;  %v3806_v26 = vld [vmem:[%s5608_s1 + $0xc4] ss:$16 sps:$4 sm:$0xff]   ;;  %v3811_v29 = vld [vmem:[%s5608_s1 + $0xc0] ss:$16 sps:$4 sm:$0xff]   ;;  %v3834_v43 = vld [vmem:[%s5608_s1 + $0xcc] ss:$16 sps:$4 sm:$0xff]  }
   0xd   :  { %2022 = vmatprep.subr.bf16.mxu1 %v3789_v14  ;;  %v3812_v30 = vld [vmem:[%s5608_s1 + $0xe4] ss:$16 sps:$4 sm:$0xff]   ;;  %v3817_v33 = vld [vmem:[%s5608_s1 + $0xe0] ss:$16 sps:$4 sm:$0xff]   ;;  %v3832_v44 = vld [vmem:[%s5608_s1 + $0xc8] ss:$16 sps:$4 sm:$0xff]  }
   0xe   :  { %v3818_v34 = vld [vmem:[%s5608_s1 + $0x104] ss:$16 sps:$4 sm:$0xff]   ;;  %v3823_v37 = vld [vmem:[%s5608_s1 + $0x100] ss:$16 sps:$4 sm:$0xff]   ;;  %v3840_v47 = vld [vmem:[%s5608_s1 + $0xec] ss:$16 sps:$4 sm:$0xff]  }
   0xf   :  { %1811 = vmatpush1.bf16.msra.mxu0 %v3791_v15  ;;  %v3824_v38 = vld [vmem:[%s5608_s1 + $0x124] ss:$16 sps:$4 sm:$0xff]   ;;  %v3829_v41 = vld [vmem:[%s5608_s1 + $0x120] ss:$16 sps:$4 sm:$0xff]   ;;  %v3838_v48 = vld [vmem:[%s5608_s1 + $0xe8] ss:$16 sps:$4 sm:$0xff]  }
  0x10   :  { %2023 = vmatpush1.bf16.msra.mxu1 %v3792_v16  ;;  %1812 = vmatprep.subr.bf16.mxu0 %v3793_v17  ;;  %v3830_v42 = vld [vmem:[%s5608_s1 + $0x144] ss:$16 sps:$4 sm:$0xff]   ;;  %v3835_v45 = vld [vmem:[%s5608_s1 + $0x140] ss:$16 sps:$4 sm:$0xff]   ;;  %v3846_v52 = vld [vmem:[%s5608_s1 + $0x10c] ss:$16 sps:$4 sm:$0xff]  }
  0x11   :  { %2069 = vmatprep.subr.bf16.mxu1 %v3797_v18  ;;  %v3836_v46 = vld [vmem:[%s5608_s1 + $0x164] ss:$16 sps:$4 sm:$0xff]   ;;  %v3841_v49 = vld [vmem:[%s5608_s1 + $0x160] ss:$16 sps:$4 sm:$0xff]   ;;  %v3844_v53 = vld [vmem:[%s5608_s1 + $0x108] ss:$16 sps:$4 sm:$0xff]  }
  0x12   :  { %v3842_v50 = vld [vmem:[%s5608_s1 + $0x184] ss:$16 sps:$4 sm:$0xff]   ;;  %v3847_v54 = vld [vmem:[%s5608_s1 + $0x180] ss:$16 sps:$4 sm:$0xff]   ;;  %v3852_v56 = vld [vmem:[%s5608_s1 + $0x12c] ss:$16 sps:$4 sm:$0xff]  }
  0x13   :  { %3520 = vmatmul.mubr.msk.bf16.vlgmr.msra.gmra.mrb[0].mxu1 %vm1797_vm0, %v3799_v19  ;;  %1813 = vmatpush1.bf16.msra.mxu0 %v3798_v21  ;;  %v3868_v51 = vld [vmem:[%s5609_s0 + $0x4] ss:$36 sps:$4 sm:$0xff]   ;;  %v3853_v58 = vld [vmem:[%s5608_s1 + $0x1a0] ss:$16 sps:$4 sm:$0xff]   ;;  %v3858_v60 = vld [vmem:[%s5608_s1 + $0x14c] ss:$16 sps:$4 sm:$0xff]  }
  0x14   :  { %2070 = vmatpush1.bf16.msra.mxu1 %v3795_v20  ;;  %1814 = vmatprep.subr.bf16.mxu0 %v3800_v22  ;;  %v3848_v55 = vld [vmem:[%s5608_s1 + $0x1a4] ss:$16 sps:$4 sm:$0xff]   ;;  %v3850_v57 = vld [vmem:[%s5608_s1 + $0x128] ss:$16 sps:$4 sm:$0xff]   ;;  %v3859_v63 = vld [vmem:[%s5608_s1 + $0x1c0] ss:$16 sps:$4 sm:$0xff]  }
  0x15   :  { %2071 = vmatprep.subr.bf16.mxu1 %v3804_v23  ;;  %2058 = vmatprep.mubr.bf16.mxu1 %v4341_v1  ;;  %v3854_v59 = vld [vmem:[%s5608_s1 + $0x1c4] ss:$16 sps:$4 sm:$0xff]   ;;  %v3887_v61 = vld [vmem:[%s5609_s0 + $0x68] ss:$36 sps:$4 sm:$0xff]   ;;  %v3865_v4 = vld [vmem:[%s5608_s1 + $0x1e0] ss:$16 sps:$4 sm:$0xff]  }
  0x16   :  { %1836 = vmatprep.mubr.bf16.mxu0 %v3868_v51  ;;  %v3856_v62 = vld [vmem:[%s5608_s1 + $0x148] ss:$16 sps:$4 sm:$0xff]   ;;  %v3860_v0 = vld [vmem:[%s5608_s1 + $0x1e4] ss:$16 sps:$4 sm:$0xff]   ;;  %v3864_v2 = vld [vmem:[%s5608_s1 + $0x16c] ss:$16 sps:$4 sm:$0xff]  }
  0x17   :  { %1815 = vmatpush1.bf16.msra.mxu0 %v3805_v25  ;;  %v3862_v3 = vld [vmem:[%s5608_s1 + $0x168] ss:$16 sps:$4 sm:$0xff]   ;;  %v3871_v5 = vld [vmem:[%s5608_s1 + $0x204] ss:$16 sps:$4 sm:$0xff]   ;;  %v3874_v6 = vld [vmem:[%s5608_s1 + $0x18c] ss:$16 sps:$4 sm:$0xff]  }
  0x18   :  { %2072 = vmatpush1.bf16.msra.mxu1 %v3802_v24  ;;  %1816 = vmatprep.subr.bf16.mxu0 %v3806_v26  ;;  %v3866_v7 = vld [vmem:[%s5609_s0] ss:$36 sps:$4 sm:$0xff]   ;;  %v3872_v9 = vld [vmem:[%s5608_s1 + $0x188] ss:$16 sps:$4 sm:$0xff]   ;;  %v3880_v11 = vld [vmem:[%s5608_s1 + $0x1ac] ss:$16 sps:$4 sm:$0xff]  }
  0x19   :  { %2073 = vmatprep.subr.bf16.mxu1 %v3810_v27  ;;  %v3869_v8 = vld [vmem:[%s5608_s1 + $0x200] ss:$16 sps:$4 sm:$0xff]   ;;  %v3877_v10 = vld [vmem:[%s5608_s1 + $0x224] ss:$16 sps:$4 sm:$0xff]   ;;  %v3878_v13 = vld [vmem:[%s5608_s1 + $0x1a8] ss:$16 sps:$4 sm:$0xff]  }
  0x1a   :  { %v3875_v12 = vld [vmem:[%s5608_s1 + $0x220] ss:$16 sps:$4 sm:$0xff]   ;;  %v3883_v14 = vld [vmem:[%s5608_s1 + $0x244] ss:$16 sps:$4 sm:$0xff]   ;;  %v3886_v15 = vld [vmem:[%s5608_s1 + $0x1cc] ss:$16 sps:$4 sm:$0xff]  }
  0x1b   :  { %1817 = vmatpush1.bf16.msra.mxu0 %v3811_v29  ;;  %3521 = vmatmul.mubr.msk.bf16.gmra.mrb[4].mxu1 %vm1797_vm0, %v3887_v61  ;;  %v3881_v16 = vld [vmem:[%s5608_s1 + $0x240] ss:$16 sps:$4 sm:$0xff]   ;;  %v3884_v17 = vld [vmem:[%s5608_s1 + $0x1c8] ss:$16 sps:$4 sm:$0xff]   ;;  %v3890_v18 = vld [vmem:[%s5608_s1 + $0x264] ss:$16 sps:$4 sm:$0xff]  }
  0x1c   :  { %2074 = vmatpush1.bf16.msra.mxu1 %v3808_v28  ;;  %1818 = vmatprep.subr.bf16.mxu0 %v3812_v30  ;;  %v3893_v19 = vld [vmem:[%s5608_s1 + $0x1ec] ss:$16 sps:$4 sm:$0xff]   ;;  %v3888_v20 = vld [vmem:[%s5608_s1 + $0x260] ss:$16 sps:$4 sm:$0xff]   ;;  %v3891_v21 = vld [vmem:[%s5608_s1 + $0x1e8] ss:$16 sps:$4 sm:$0xff]  }
  0x1d   :  { %2075 = vmatprep.subr.bf16.mxu1 %v3816_v31  ;;  %2101 = vmatprep.mubr.bf16.mxu1 %v3868_v51  ;;  %v3896_v22 = vld [vmem:[%s5608_s1 + $0x284] ss:$16 sps:$4 sm:$0xff]   ;;  %v3899_v23 = vld [vmem:[%s5608_s1 + $0x20c] ss:$16 sps:$4 sm:$0xff]   ;;  %v3894_v24 = vld [vmem:[%s5608_s1 + $0x280] ss:$16 sps:$4 sm:$0xff]  }
  0x1e   :  { %v3897_v25 = vld [vmem:[%s5608_s1 + $0x208] ss:$16 sps:$4 sm:$0xff]   ;;  %v3902_v26 = vld [vmem:[%s5608_s1 + $0x2a4] ss:$16 sps:$4 sm:$0xff]   ;;  %v3905_v27 = vld [vmem:[%s5608_s1 + $0x22c] ss:$16 sps:$4 sm:$0xff]  }
  0x1f   :  { %1819 = vmatpush1.bf16.msra.mxu0 %v3817_v33  ;;  %v3900_v28 = vld [vmem:[%s5608_s1 + $0x2a0] ss:$16 sps:$4 sm:$0xff]   ;;  %v3903_v29 = vld [vmem:[%s5608_s1 + $0x228] ss:$16 sps:$4 sm:$0xff]   ;;  %v3908_v31 = vld [vmem:[%s5608_s1 + $0x2c4] ss:$16 sps:$4 sm:$0xff]  }
  0x20   :  { %2076 = vmatpush1.bf16.msra.mxu1 %v3814_v32  ;;  %1820 = vmatprep.subr.bf16.mxu0 %v3818_v34  ;;  %v3954_v30 = vld [vmem:[%s5609_s0 + $0x4c] ss:$36 sps:$4 sm:$0xff]   ;;  %v3950_v61 = vld [vmem:[%s5608_s1 + $0x3a4] ss:$16 sps:$4 sm:$0xff]  }
  0x21   :  { %2077 = vmatprep.subr.bf16.mxu1 %v3822_v35  ;;  %v3911_v32 = vld [vmem:[%s5608_s1 + $0x24c] ss:$16 sps:$4 sm:$0xff]   ;;  %v3906_v34 = vld [vmem:[%s5608_s1 + $0x2c0] ss:$16 sps:$4 sm:$0xff]   ;;  %v3909_v35 = vld [vmem:[%s5608_s1 + $0x248] ss:$16 sps:$4 sm:$0xff]  }
  0x22   :  { %v3962_v33 = vld [vmem:[%s5609_s0 + $0x48] ss:$36 sps:$4 sm:$0xff]   ;;  %v3930_v51 = vld [vmem:[%s5608_s1 + $0x340] ss:$16 sps:$4 sm:$0xff]  }
  0x23   :  { %1821 = vmatpush1.bf16.msra.mxu0 %v3823_v37  ;;  %v3917_v37 = vld [vmem:[%s5608_s1 + $0x26c] ss:$16 sps:$4 sm:$0xff]  }
  0x24   :  { %2078 = vmatpush1.bf16.msra.mxu1 %v3820_v36  ;;  %1822 = vmatprep.subr.bf16.mxu0 %v3824_v38  ;;  %v3914_v36 = vld [vmem:[%s5608_s1 + $0x2e4] ss:$16 sps:$4 sm:$0xff]   ;;  %v3971_v38 = vld [vmem:[%s5609_s0 + $0xc] ss:$36 sps:$4 sm:$0xff]  }
  0x25   :  { %2079 = vmatprep.subr.bf16.mxu1 %v3828_v39  ;;  %v3912_v39 = vld [vmem:[%s5608_s1 + $0x2e0] ss:$16 sps:$4 sm:$0xff]  }
  0x27   :  { %1823 = vmatpush1.bf16.msra.mxu0 %v3829_v41  ;;  %v3920_v41 = vld [vmem:[%s5608_s1 + $0x304] ss:$16 sps:$4 sm:$0xff]  }
  0x28   :  { %2080 = vmatpush1.bf16.msra.mxu1 %v3826_v40  ;;  %1824 = vmatprep.subr.bf16.mxu0 %v3830_v42  ;;  %v3915_v40 = vld [vmem:[%s5608_s1 + $0x268] ss:$16 sps:$4 sm:$0xff]   ;;  %v3923_v42 = vld [vmem:[%s5608_s1 + $0x28c] ss:$16 sps:$4 sm:$0xff]  }
  0x29   :  { %2081 = vmatprep.subr.bf16.mxu1 %v3834_v43  ;;  %v3918_v43 = vld [vmem:[%s5608_s1 + $0x300] ss:$16 sps:$4 sm:$0xff]  }
  0x2b   :  { %1825 = vmatpush1.bf16.msra.mxu0 %v3835_v45  ;;  %v3926_v45 = vld [vmem:[%s5608_s1 + $0x324] ss:$16 sps:$4 sm:$0xff]  }
  0x2c   :  { %2082 = vmatpush1.bf16.msra.mxu1 %v3832_v44  ;;  %1826 = vmatprep.subr.bf16.mxu0 %v3836_v46  ;;  %v3921_v44 = vld [vmem:[%s5608_s1 + $0x288] ss:$16 sps:$4 sm:$0xff]   ;;  %v3929_v46 = vld [vmem:[%s5608_s1 + $0x2ac] ss:$16 sps:$4 sm:$0xff]  }
  0x2d   :  { %2083 = vmatprep.subr.bf16.mxu1 %v3840_v47  ;;  %v3924_v47 = vld [vmem:[%s5608_s1 + $0x320] ss:$16 sps:$4 sm:$0xff]  }
  0x2f   :  { %1827 = vmatpush1.bf16.msra.mxu0 %v3841_v49  ;;  %v3932_v49 = vld [vmem:[%s5608_s1 + $0x344] ss:$16 sps:$4 sm:$0xff]  }
  0x30   :  { %2084 = vmatpush1.bf16.msra.mxu1 %v3838_v48  ;;  %1828 = vmatprep.subr.bf16.mxu0 %v3842_v50  ;;  %v3927_v48 = vld [vmem:[%s5608_s1 + $0x2a8] ss:$16 sps:$4 sm:$0xff]   ;;  %v3935_v50 = vld [vmem:[%s5608_s1 + $0x2cc] ss:$16 sps:$4 sm:$0xff]  }
  0x31   :  { %2085 = vmatprep.subr.bf16.mxu1 %v3846_v52  ;;  %v3933_v52 = vld [vmem:[%s5608_s1 + $0x2c8] ss:$16 sps:$4 sm:$0xff]  }
  0x33   :  { %1829 = vmatpush1.bf16.msra.mxu0 %v3847_v54  ;;  %v3941_v54 = vld [vmem:[%s5608_s1 + $0x2ec] ss:$16 sps:$4 sm:$0xff]  }
  0x34   :  { %2086 = vmatpush1.bf16.msra.mxu1 %v3844_v53  ;;  %1830 = vmatprep.subr.bf16.mxu0 %v3848_v55  ;;  %v3938_v53 = vld [vmem:[%s5608_s1 + $0x364] ss:$16 sps:$4 sm:$0xff]   ;;  %v3936_v55 = vld [vmem:[%s5608_s1 + $0x360] ss:$16 sps:$4 sm:$0xff]  }
  0x35   :  { %2087 = vmatprep.subr.bf16.mxu1 %v3852_v56  ;;  %v3939_v56 = vld [vmem:[%s5608_s1 + $0x2e8] ss:$16 sps:$4 sm:$0xff]  }
  0x37   :  { %1831 = vmatpush1.bf16.msra.mxu0 %v3853_v58  ;;  %v3947_v58 = vld [vmem:[%s5608_s1 + $0x30c] ss:$16 sps:$4 sm:$0xff]  }
  0x38   :  { %2088 = vmatpush1.bf16.msra.mxu1 %v3850_v57  ;;  %1832 = vmatprep.subr.bf16.mxu0 %v3854_v59  ;;  %v3944_v57 = vld [vmem:[%s5608_s1 + $0x384] ss:$16 sps:$4 sm:$0xff]   ;;  %v3942_v59 = vld [vmem:[%s5608_s1 + $0x380] ss:$16 sps:$4 sm:$0xff]  }
  0x39   :  { %2089 = vmatprep.subr.bf16.mxu1 %v3858_v60  ;;  %v3945_v60 = vld [vmem:[%s5608_s1 + $0x308] ss:$16 sps:$4 sm:$0xff]  }
  0x3b   :  { %1833 = vmatpush1.bf16.msra.mxu0 %v3859_v63  ;;  %v3948_v63 = vld [vmem:[%s5608_s1 + $0x3a0] ss:$16 sps:$4 sm:$0xff]  }
  0x3c   :  { %2090 = vmatpush1.bf16.msra.mxu1 %v3856_v62  ;;  %1834 = vmatprep.subr.bf16.mxu0 %v3860_v0  ;;  %v3953_v62 = vld [vmem:[%s5608_s1 + $0x32c] ss:$16 sps:$4 sm:$0xff]   ;;  %v3951_v0 = vld [vmem:[%s5608_s1 + $0x328] ss:$16 sps:$4 sm:$0xff]  }
  0x3d   :  { %2091 = vmatprep.subr.bf16.mxu1 %v3864_v2  ;;  %v3958_v2 = vld [vmem:[%s5608_s1 + $0x3c4] ss:$16 sps:$4 sm:$0xff]  }
  0x3f   :  { %1835 = vmatpush1.bf16.msra.mxu0 %v3865_v4  ;;  %v3956_v4 = vld [vmem:[%s5608_s1 + $0x3c0] ss:$16 sps:$4 sm:$0xff]  }
  0x40   :  { %2092 = vmatpush1.bf16.msra.mxu1 %v3862_v3  ;;  %1857 = vmatprep.subr.bf16.mxu0 %v3871_v5  ;;  %v3961_v3 = vld [vmem:[%s5608_s1 + $0x34c] ss:$16 sps:$4 sm:$0xff]   ;;  %v3959_v5 = vld [vmem:[%s5608_s1 + $0x348] ss:$16 sps:$4 sm:$0xff]  }
  0x41   :  { %2093 = vmatprep.subr.bf16.mxu1 %v3874_v6  ;;  %v3965_v6 = vld [vmem:[%s5608_s1 + $0x3e4] ss:$16 sps:$4 sm:$0xff]  }
  0x42   :  { %1837 = vmatmul.mubr.bf16.vlgmr.msra.gmra.mrb[0].mxu0 %v3866_v7 }
  0x43   :  { %1858 = vmatpush1.bf16.msra.mxu0 %v3869_v8  ;;  %1846 = vmatprep.mubr.bf16.mxu0 %v3954_v30  ;;  %v3963_v8 = vld [vmem:[%s5608_s1 + $0x3e0] ss:$16 sps:$4 sm:$0xff]  }
  0x44   :  { %2094 = vmatpush1.bf16.msra.mxu1 %v3872_v9  ;;  %1859 = vmatprep.subr.bf16.mxu0 %v3877_v10  ;;  %v3966_v9 = vld [vmem:[%s5608_s1 + $0x368] ss:$16 sps:$4 sm:$0xff]   ;;  %v3974_v10 = vld [vmem:[%s5608_s1 + $0x404] ss:$16 sps:$4 sm:$0xff]  }
  0x45   :  { %2095 = vmatprep.subr.bf16.mxu1 %v3880_v11  ;;  %v3977_v11 = vld [vmem:[%s5608_s1 + $0x38c] ss:$16 sps:$4 sm:$0xff]  }
  0x47   :  { %1860 = vmatpush1.bf16.msra.mxu0 %v3875_v12  ;;  %v3969_v12 = vld [vmem:[%s5609_s0 + $0x8] ss:$36 sps:$4 sm:$0xff]  }
  0x48   :  { %2096 = vmatpush1.bf16.msra.mxu1 %v3878_v13  ;;  %1861 = vmatprep.subr.bf16.mxu0 %v3883_v14  ;;  %v3972_v13 = vld [vmem:[%s5608_s1 + $0x400] ss:$16 sps:$4 sm:$0xff]   ;;  %v3975_v14 = vld [vmem:[%s5608_s1 + $0x388] ss:$16 sps:$4 sm:$0xff]  }
  0x49   :  { %2097 = vmatprep.subr.bf16.mxu1 %v3886_v15  ;;  %v3980_v15 = vld [vmem:[%s5608_s1 + $0x424] ss:$16 sps:$4 sm:$0xff]  }
  0x4a   :  { %1847 = vmatmul.mubr.bf16.gmra.mrb[4].mxu0 %v3962_v33 }
  0x4b   :  { %1862 = vmatpush1.bf16.msra.mxu0 %v3881_v16  ;;  %1889 = vmatprep.mubr.bf16.mxu0 %v3971_v38  ;;  %v3983_v16 = vld [vmem:[%s5608_s1 + $0x3ac] ss:$16 sps:$4 sm:$0xff]  }
  0x4c   :  { %2098 = vmatpush1.bf16.msra.mxu1 %v3884_v17  ;;  %1863 = vmatprep.subr.bf16.mxu0 %v3890_v18  ;;  %v4056_v17 = vld [vmem:[%s5609_s0 + $0x54] ss:$36 sps:$4 sm:$0xff]   ;;  %v3978_v18 = vld [vmem:[%s5608_s1 + $0x420] ss:$16 sps:$4 sm:$0xff]  }
  0x4d   :  { %2099 = vmatprep.subr.bf16.mxu1 %v3893_v19  ;;  %v3981_v19 = vld [vmem:[%s5608_s1 + $0x3a8] ss:$16 sps:$4 sm:$0xff]  }
  0x4f   :  { %1864 = vmatpush1.bf16.msra.mxu0 %v3888_v20  ;;  %v3986_v20 = vld [vmem:[%s5608_s1 + $0x444] ss:$16 sps:$4 sm:$0xff]  }
  0x50   :  { %2100 = vmatpush1.bf16.msra.mxu1 %v3891_v21  ;;  %1865 = vmatprep.subr.bf16.mxu0 %v3896_v22  ;;  %v3989_v21 = vld [vmem:[%s5608_s1 + $0x3cc] ss:$16 sps:$4 sm:$0xff]   ;;  %v4064_v22 = vld [vmem:[%s5609_s0 + $0x50] ss:$36 sps:$4 sm:$0xff]  }
  0x51   :  { %2122 = vmatprep.subr.bf16.mxu1 %v3899_v23  ;;  %v3984_v23 = vld [vmem:[%s5608_s1 + $0x440] ss:$16 sps:$4 sm:$0xff]  }
  0x53   :  { %2102 = vmatmul.mubr.bf16.vlgmr.msra.gmra.mrb[8].mxu1 %v3866_v7  ;;  %1866 = vmatpush1.bf16.msra.mxu0 %v3894_v24  ;;  %v3968_v7 = vld [vmem:[%s5608_s1 + $0x36c] ss:$16 sps:$4 sm:$0xff]   ;;  %v3987_v24 = vld [vmem:[%s5608_s1 + $0x3c8] ss:$16 sps:$4 sm:$0xff]  }
  0x54   :  { %2123 = vmatpush1.bf16.msra.mxu1 %v3897_v25  ;;  %1867 = vmatprep.subr.bf16.mxu0 %v3902_v26  ;;  %v3992_v25 = vld [vmem:[%s5608_s1 + $0x464] ss:$16 sps:$4 sm:$0xff]   ;;  %v3995_v26 = vld [vmem:[%s5608_s1 + $0x3ec] ss:$16 sps:$4 sm:$0xff]  }
  0x55   :  { %2124 = vmatprep.subr.bf16.mxu1 %v3905_v27  ;;  %2111 = vmatprep.mubr.bf16.mxu1 %v3954_v30  ;;  %v4073_v27 = vld [vmem:[%s5609_s0 + $0x14] ss:$36 sps:$4 sm:$0xff]  }
  0x56   :  { %v3998_v30 = vld [vmem:[%s5608_s1 + $0x484] ss:$16 sps:$4 sm:$0xff]  }
  0x57   :  { %1868 = vmatpush1.bf16.msra.mxu0 %v3900_v28  ;;  %v3990_v28 = vld [vmem:[%s5608_s1 + $0x460] ss:$16 sps:$4 sm:$0xff]  }
  0x58   :  { %2125 = vmatpush1.bf16.msra.mxu1 %v3903_v29  ;;  %1869 = vmatprep.subr.bf16.mxu0 %v3908_v31  ;;  %v3993_v29 = vld [vmem:[%s5608_s1 + $0x3e8] ss:$16 sps:$4 sm:$0xff]   ;;  %v4001_v31 = vld [vmem:[%s5608_s1 + $0x40c] ss:$16 sps:$4 sm:$0xff]  }
  0x59   :  { %2126 = vmatprep.subr.bf16.mxu1 %v3911_v32  ;;  %v3996_v32 = vld [vmem:[%s5608_s1 + $0x480] ss:$16 sps:$4 sm:$0xff]  }
  0x5b   :  { %2112 = vmatmul.mubr.bf16.gmra.mrb[12].mxu1 %v3962_v33  ;;  %1870 = vmatpush1.bf16.msra.mxu0 %v3906_v34  ;;  %v3999_v33 = vld [vmem:[%s5608_s1 + $0x408] ss:$16 sps:$4 sm:$0xff]   ;;  %v4004_v34 = vld [vmem:[%s5608_s1 + $0x4a4] ss:$16 sps:$4 sm:$0xff]  }
  0x5c   :  { %2127 = vmatpush1.bf16.msra.mxu1 %v3909_v35  ;;  %1871 = vmatprep.subr.bf16.mxu0 %v3914_v36  ;;  %v4007_v35 = vld [vmem:[%s5608_s1 + $0x42c] ss:$16 sps:$4 sm:$0xff]   ;;  %v4002_v36 = vld [vmem:[%s5608_s1 + $0x4a0] ss:$16 sps:$4 sm:$0xff]  }
  0x5d   :  { %2128 = vmatprep.subr.bf16.mxu1 %v3917_v37  ;;  %2154 = vmatprep.mubr.bf16.mxu1 %v3971_v38  ;;  %v4005_v37 = vld [vmem:[%s5608_s1 + $0x428] ss:$16 sps:$4 sm:$0xff]   ;;  %v4010_v38 = vld [vmem:[%s5608_s1 + $0x4c4] ss:$16 sps:$4 sm:$0xff]  }
  0x5f   :  { %1872 = vmatpush1.bf16.msra.mxu0 %v3912_v39  ;;  %v4013_v39 = vld [vmem:[%s5608_s1 + $0x44c] ss:$16 sps:$4 sm:$0xff]  }
  0x60   :  { %2129 = vmatpush1.bf16.msra.mxu1 %v3915_v40  ;;  %1873 = vmatprep.subr.bf16.mxu0 %v3920_v41  ;;  %v4008_v40 = vld [vmem:[%s5608_s1 + $0x4c0] ss:$16 sps:$4 sm:$0xff]   ;;  %v4011_v41 = vld [vmem:[%s5608_s1 + $0x448] ss:$16 sps:$4 sm:$0xff]  }
  0x61   :  { %2130 = vmatprep.subr.bf16.mxu1 %v3923_v42  ;;  %v4016_v42 = vld [vmem:[%s5608_s1 + $0x4e4] ss:$16 sps:$4 sm:$0xff]  }
  0x63   :  { %1874 = vmatpush1.bf16.msra.mxu0 %v3918_v43  ;;  %v4019_v43 = vld [vmem:[%s5608_s1 + $0x46c] ss:$16 sps:$4 sm:$0xff]  }
  0x64   :  { %2131 = vmatpush1.bf16.msra.mxu1 %v3921_v44  ;;  %1875 = vmatprep.subr.bf16.mxu0 %v3926_v45  ;;  %v4014_v44 = vld [vmem:[%s5608_s1 + $0x4e0] ss:$16 sps:$4 sm:$0xff]   ;;  %v4017_v45 = vld [vmem:[%s5608_s1 + $0x468] ss:$16 sps:$4 sm:$0xff]  }
  0x65   :  { %2132 = vmatprep.subr.bf16.mxu1 %v3929_v46  ;;  %v4022_v46 = vld [vmem:[%s5608_s1 + $0x504] ss:$16 sps:$4 sm:$0xff]  }
  0x67   :  { %1876 = vmatpush1.bf16.msra.mxu0 %v3924_v47  ;;  %v4025_v47 = vld [vmem:[%s5608_s1 + $0x48c] ss:$16 sps:$4 sm:$0xff]  }
  0x68   :  { %2133 = vmatpush1.bf16.msra.mxu1 %v3927_v48  ;;  %1877 = vmatprep.subr.bf16.mxu0 %v3932_v49  ;;  %v4020_v48 = vld [vmem:[%s5608_s1 + $0x500] ss:$16 sps:$4 sm:$0xff]   ;;  %v4023_v49 = vld [vmem:[%s5608_s1 + $0x488] ss:$16 sps:$4 sm:$0xff]  }
  0x69   :  { %2134 = vmatprep.subr.bf16.mxu1 %v3935_v50  ;;  %v4028_v50 = vld [vmem:[%s5608_s1 + $0x524] ss:$16 sps:$4 sm:$0xff]  }
  0x6b   :  { %1878 = vmatpush1.bf16.msra.mxu0 %v3930_v51  ;;  %v4031_v51 = vld [vmem:[%s5608_s1 + $0x4ac] ss:$16 sps:$4 sm:$0xff]  }
  0x6c   :  { %2135 = vmatpush1.bf16.msra.mxu1 %v3933_v52  ;;  %1879 = vmatprep.subr.bf16.mxu0 %v3938_v53  ;;  %v4026_v52 = vld [vmem:[%s5608_s1 + $0x520] ss:$16 sps:$4 sm:$0xff]   ;;  %v4029_v53 = vld [vmem:[%s5608_s1 + $0x4a8] ss:$16 sps:$4 sm:$0xff]  }
  0x6d   :  { %2136 = vmatprep.subr.bf16.mxu1 %v3941_v54  ;;  %v4034_v54 = vld [vmem:[%s5608_s1 + $0x544] ss:$16 sps:$4 sm:$0xff]  }
  0x6f   :  { %1880 = vmatpush1.bf16.msra.mxu0 %v3936_v55  ;;  %v4037_v55 = vld [vmem:[%s5608_s1 + $0x4cc] ss:$16 sps:$4 sm:$0xff]  }
  0x70   :  { %2137 = vmatpush1.bf16.msra.mxu1 %v3939_v56  ;;  %1881 = vmatprep.subr.bf16.mxu0 %v3944_v57  ;;  %v4032_v56 = vld [vmem:[%s5608_s1 + $0x540] ss:$16 sps:$4 sm:$0xff]   ;;  %v4035_v57 = vld [vmem:[%s5608_s1 + $0x4c8] ss:$16 sps:$4 sm:$0xff]  }
  0x71   :  { %2138 = vmatprep.subr.bf16.mxu1 %v3947_v58  ;;  %v4040_v58 = vld [vmem:[%s5608_s1 + $0x564] ss:$16 sps:$4 sm:$0xff]  }
  0x73   :  { %1882 = vmatpush1.bf16.msra.mxu0 %v3942_v59  ;;  %v4043_v59 = vld [vmem:[%s5608_s1 + $0x4ec] ss:$16 sps:$4 sm:$0xff]  }
  0x74   :  { %2139 = vmatpush1.bf16.msra.mxu1 %v3945_v60  ;;  %1883 = vmatprep.subr.bf16.mxu0 %v3950_v61  ;;  %v4038_v60 = vld [vmem:[%s5608_s1 + $0x560] ss:$16 sps:$4 sm:$0xff]   ;;  %v4041_v61 = vld [vmem:[%s5608_s1 + $0x4e8] ss:$16 sps:$4 sm:$0xff]  }
  0x75   :  { %2140 = vmatprep.subr.bf16.mxu1 %v3953_v62  ;;  %v4046_v62 = vld [vmem:[%s5608_s1 + $0x584] ss:$16 sps:$4 sm:$0xff]  }
  0x77   :  { %1884 = vmatpush1.bf16.msra.mxu0 %v3948_v63  ;;  %v4049_v63 = vld [vmem:[%s5608_s1 + $0x50c] ss:$16 sps:$4 sm:$0xff]  }
  0x78   :  { %2141 = vmatpush1.bf16.msra.mxu1 %v3951_v0  ;;  %1885 = vmatprep.subr.bf16.mxu0 %v3958_v2  ;;  %v4044_v0 = vld [vmem:[%s5608_s1 + $0x580] ss:$16 sps:$4 sm:$0xff]   ;;  %v4047_v2 = vld [vmem:[%s5608_s1 + $0x508] ss:$16 sps:$4 sm:$0xff]  }
  0x79   :  { %2142 = vmatprep.subr.bf16.mxu1 %v3961_v3  ;;  %v4052_v3 = vld [vmem:[%s5608_s1 + $0x5a4] ss:$16 sps:$4 sm:$0xff]  }
  0x7b   :  { %1886 = vmatpush1.bf16.msra.mxu0 %v3956_v4  ;;  %v4055_v4 = vld [vmem:[%s5608_s1 + $0x52c] ss:$16 sps:$4 sm:$0xff]  }
  0x7c   :  { %2143 = vmatpush1.bf16.msra.mxu1 %v3959_v5  ;;  %1887 = vmatprep.subr.bf16.mxu0 %v3965_v6  ;;  %v4050_v5 = vld [vmem:[%s5608_s1 + $0x5a0] ss:$16 sps:$4 sm:$0xff]   ;;  %v4053_v6 = vld [vmem:[%s5608_s1 + $0x528] ss:$16 sps:$4 sm:$0xff]  }
  0x7d   :  { %2144 = vmatprep.subr.bf16.mxu1 %v3968_v7  ;;  %v4060_v7 = vld [vmem:[%s5608_s1 + $0x5c4] ss:$16 sps:$4 sm:$0xff]  }
  0x7f   :  { %1888 = vmatpush1.bf16.msra.mxu0 %v3963_v8  ;;  %v4063_v8 = vld [vmem:[%s5608_s1 + $0x54c] ss:$16 sps:$4 sm:$0xff]  }
  0x80   :  { %2145 = vmatpush1.bf16.msra.mxu1 %v3966_v9  ;;  %1910 = vmatprep.subr.bf16.mxu0 %v3974_v10  ;;  %v4058_v9 = vld [vmem:[%s5608_s1 + $0x5c0] ss:$16 sps:$4 sm:$0xff]   ;;  %v4061_v10 = vld [vmem:[%s5608_s1 + $0x548] ss:$16 sps:$4 sm:$0xff]  }
  0x81   :  { %2146 = vmatprep.subr.bf16.mxu1 %v3977_v11  ;;  %v4067_v11 = vld [vmem:[%s5608_s1 + $0x5e4] ss:$16 sps:$4 sm:$0xff]  }
  0x82   :  { %1890 = vmatmul.mubr.bf16.vlgmr.msra.gmra.mrb[0].mxu0 %v3969_v12 }
  0x83   :  { %1911 = vmatpush1.bf16.msra.mxu0 %v3972_v13  ;;  %1899 = vmatprep.mubr.bf16.mxu0 %v4056_v17  ;;  %v4065_v13 = vld [vmem:[%s5608_s1 + $0x5e0] ss:$16 sps:$4 sm:$0xff]  }
  0x84   :  { %2147 = vmatpush1.bf16.msra.mxu1 %v3975_v14  ;;  %1912 = vmatprep.subr.bf16.mxu0 %v3980_v15  ;;  %v4068_v14 = vld [vmem:[%s5608_s1 + $0x568] ss:$16 sps:$4 sm:$0xff]   ;;  %v4076_v15 = vld [vmem:[%s5608_s1 + $0x604] ss:$16 sps:$4 sm:$0xff]  }
  0x85   :  { %2148 = vmatprep.subr.bf16.mxu1 %v3983_v16  ;;  %v4079_v16 = vld [vmem:[%s5608_s1 + $0x58c] ss:$16 sps:$4 sm:$0xff]  }
  0x87   :  { %1913 = vmatpush1.bf16.msra.mxu0 %v3978_v18  ;;  %v4074_v18 = vld [vmem:[%s5608_s1 + $0x600] ss:$16 sps:$4 sm:$0xff]  }
  0x88   :  { %2149 = vmatpush1.bf16.msra.mxu1 %v3981_v19  ;;  %1914 = vmatprep.subr.bf16.mxu0 %v3986_v20  ;;  %v4077_v19 = vld [vmem:[%s5608_s1 + $0x588] ss:$16 sps:$4 sm:$0xff]   ;;  %v4082_v20 = vld [vmem:[%s5608_s1 + $0x624] ss:$16 sps:$4 sm:$0xff]  }
  0x89   :  { %2150 = vmatprep.subr.bf16.mxu1 %v3989_v21  ;;  %v4085_v21 = vld [vmem:[%s5608_s1 + $0x5ac] ss:$16 sps:$4 sm:$0xff]  }
  0x8a   :  { %1900 = vmatmul.mubr.bf16.gmra.mrb[4].mxu0 %v4064_v22 }
  0x8b   :  { %1915 = vmatpush1.bf16.msra.mxu0 %v3984_v23  ;;  %1942 = vmatprep.mubr.bf16.mxu0 %v4073_v27  ;;  %v4080_v23 = vld [vmem:[%s5608_s1 + $0x620] ss:$16 sps:$4 sm:$0xff]  }
  0x8c   :  { %2151 = vmatpush1.bf16.msra.mxu1 %v3987_v24  ;;  %1916 = vmatprep.subr.bf16.mxu0 %v3992_v25  ;;  %v4083_v24 = vld [vmem:[%s5608_s1 + $0x5a8] ss:$16 sps:$4 sm:$0xff]   ;;  %v4088_v25 = vld [vmem:[%s5608_s1 + $0x644] ss:$16 sps:$4 sm:$0xff]  }
  0x8d   :  { %2152 = vmatprep.subr.bf16.mxu1 %v3995_v26  ;;  %v4091_v26 = vld [vmem:[%s5608_s1 + $0x5cc] ss:$16 sps:$4 sm:$0xff]  }
  0x8f   :  { %1917 = vmatpush1.bf16.msra.mxu0 %v3990_v28  ;;  %v4086_v28 = vld [vmem:[%s5608_s1 + $0x640] ss:$16 sps:$4 sm:$0xff]  }
  0x90   :  { %2153 = vmatpush1.bf16.msra.mxu1 %v3993_v29  ;;  %1918 = vmatprep.subr.bf16.mxu0 %v3998_v30  ;;  %v4089_v29 = vld [vmem:[%s5608_s1 + $0x5c8] ss:$16 sps:$4 sm:$0xff]   ;;  %v4094_v30 = vld [vmem:[%s5608_s1 + $0x664] ss:$16 sps:$4 sm:$0xff]  }
  0x91   :  { %2175 = vmatprep.subr.bf16.mxu1 %v4001_v31  ;;  %v4097_v31 = vld [vmem:[%s5608_s1 + $0x5ec] ss:$16 sps:$4 sm:$0xff]  }
  0x93   :  { %2155 = vmatmul.mubr.bf16.vlgmr.msra.gmra.mrb[8].mxu1 %v3969_v12  ;;  %1919 = vmatpush1.bf16.msra.mxu0 %v3996_v32  ;;  %v4070_v12 = vld [vmem:[%s5608_s1 + $0x56c] ss:$16 sps:$4 sm:$0xff]  }
  0x94   :  { %2176 = vmatpush1.bf16.msra.mxu1 %v3999_v33  ;;  %1920 = vmatprep.subr.bf16.mxu0 %v4004_v34  ;;  %v4175_v32 = vld [vmem:[%s5609_s0 + $0x1c] ss:$36 sps:$4 sm:$0xff]   ;;  %v4095_v34 = vld [vmem:[%s5608_s1 + $0x5e8] ss:$16 sps:$4 sm:$0xff]  }
  0x95   :  { %2177 = vmatprep.subr.bf16.mxu1 %v4007_v35  ;;  %2164 = vmatprep.mubr.bf16.mxu1 %v4056_v17  ;;  %v4071_v17 = vld [vmem:[%s5609_s0 + $0x10] ss:$36 sps:$4 sm:$0xff]  }
  0x96   :  { %v4092_v33 = vld [vmem:[%s5608_s1 + $0x660] ss:$16 sps:$4 sm:$0xff]   ;;  %v4100_v35 = vld [vmem:[%s5608_s1 + $0x684] ss:$16 sps:$4 sm:$0xff]  }
  0x97   :  { %1921 = vmatpush1.bf16.msra.mxu0 %v4002_v36  ;;  %v4103_v36 = vld [vmem:[%s5608_s1 + $0x60c] ss:$16 sps:$4 sm:$0xff]  }
  0x98   :  { %2178 = vmatpush1.bf16.msra.mxu1 %v4005_v37  ;;  %1922 = vmatprep.subr.bf16.mxu0 %v4010_v38  ;;  %v4098_v37 = vld [vmem:[%s5608_s1 + $0x680] ss:$16 sps:$4 sm:$0xff]   ;;  %v4101_v38 = vld [vmem:[%s5608_s1 + $0x608] ss:$16 sps:$4 sm:$0xff]  }
  0x99   :  { %2179 = vmatprep.subr.bf16.mxu1 %v4013_v39  ;;  %v4106_v39 = vld [vmem:[%s5608_s1 + $0x6a4] ss:$16 sps:$4 sm:$0xff]  }
  0x9b   :  { %2165 = vmatmul.mubr.bf16.gmra.mrb[12].mxu1 %v4064_v22  ;;  %1923 = vmatpush1.bf16.msra.mxu0 %v4008_v40  ;;  %v4158_v22 = vld [vmem:[%s5609_s0 + $0x5c] ss:$36 sps:$4 sm:$0xff]  }
  0x9c   :  { %2180 = vmatpush1.bf16.msra.mxu1 %v4011_v41  ;;  %1924 = vmatprep.subr.bf16.mxu0 %v4016_v42  ;;  %v4109_v40 = vld [vmem:[%s5608_s1 + $0x62c] ss:$16 sps:$4 sm:$0xff]   ;;  %v4104_v41 = vld [vmem:[%s5608_s1 + $0x6a0] ss:$16 sps:$4 sm:$0xff]   ;;  %v4107_v42 = vld [vmem:[%s5608_s1 + $0x628] ss:$16 sps:$4 sm:$0xff]  }
  0x9d   :  { %2181 = vmatprep.subr.bf16.mxu1 %v4019_v43  ;;  %2207 = vmatprep.mubr.bf16.mxu1 %v4073_v27  ;;  %v4160_v27 = vld [vmem:[%s5609_s0 + $0x58] ss:$36 sps:$4 sm:$0xff]   ;;  %v4112_v43 = vld [vmem:[%s5608_s1 + $0x6c4] ss:$16 sps:$4 sm:$0xff]  }
  0x9f   :  { %1925 = vmatpush1.bf16.msra.mxu0 %v4014_v44  ;;  %v4115_v44 = vld [vmem:[%s5608_s1 + $0x64c] ss:$16 sps:$4 sm:$0xff]  }
  0xa0   :  { %2182 = vmatpush1.bf16.msra.mxu1 %v4017_v45  ;;  %1926 = vmatprep.subr.bf16.mxu0 %v4022_v46  ;;  %v4110_v45 = vld [vmem:[%s5608_s1 + $0x6c0] ss:$16 sps:$4 sm:$0xff]   ;;  %v4113_v46 = vld [vmem:[%s5608_s1 + $0x648] ss:$16 sps:$4 sm:$0xff]  }
  0xa1   :  { %2183 = vmatprep.subr.bf16.mxu1 %v4025_v47  ;;  %v4118_v47 = vld [vmem:[%s5608_s1 + $0x6e4] ss:$16 sps:$4 sm:$0xff]  }
  0xa3   :  { %1927 = vmatpush1.bf16.msra.mxu0 %v4020_v48  ;;  %v4121_v48 = vld [vmem:[%s5608_s1 + $0x66c] ss:$16 sps:$4 sm:$0xff]  }
  0xa4   :  { %2184 = vmatpush1.bf16.msra.mxu1 %v4023_v49  ;;  %1928 = vmatprep.subr.bf16.mxu0 %v4028_v50  ;;  %v4116_v49 = vld [vmem:[%s5608_s1 + $0x6e0] ss:$16 sps:$4 sm:$0xff]   ;;  %v4119_v50 = vld [vmem:[%s5608_s1 + $0x668] ss:$16 sps:$4 sm:$0xff]  }
  0xa5   :  { %2185 = vmatprep.subr.bf16.mxu1 %v4031_v51  ;;  %v4124_v51 = vld [vmem:[%s5608_s1 + $0x704] ss:$16 sps:$4 sm:$0xff]  }
  0xa7   :  { %1929 = vmatpush1.bf16.msra.mxu0 %v4026_v52  ;;  %v4127_v52 = vld [vmem:[%s5608_s1 + $0x68c] ss:$16 sps:$4 sm:$0xff]  }
  0xa8   :  { %2186 = vmatpush1.bf16.msra.mxu1 %v4029_v53  ;;  %1930 = vmatprep.subr.bf16.mxu0 %v4034_v54  ;;  %v4122_v53 = vld [vmem:[%s5608_s1 + $0x700] ss:$16 sps:$4 sm:$0xff]   ;;  %v4125_v54 = vld [vmem:[%s5608_s1 + $0x688] ss:$16 sps:$4 sm:$0xff]  }
  0xa9   :  { %2187 = vmatprep.subr.bf16.mxu1 %v4037_v55  ;;  %v4130_v55 = vld [vmem:[%s5608_s1 + $0x724] ss:$16 sps:$4 sm:$0xff]  }
  0xab   :  { %1931 = vmatpush1.bf16.msra.mxu0 %v4032_v56  ;;  %v4133_v56 = vld [vmem:[%s5608_s1 + $0x6ac] ss:$16 sps:$4 sm:$0xff]  }
  0xac   :  { %2188 = vmatpush1.bf16.msra.mxu1 %v4035_v57  ;;  %1932 = vmatprep.subr.bf16.mxu0 %v4040_v58  ;;  %v4128_v57 = vld [vmem:[%s5608_s1 + $0x720] ss:$16 sps:$4 sm:$0xff]   ;;  %v4131_v58 = vld [vmem:[%s5608_s1 + $0x6a8] ss:$16 sps:$4 sm:$0xff]  }
  0xad   :  { %2189 = vmatprep.subr.bf16.mxu1 %v4043_v59  ;;  %v4136_v59 = vld [vmem:[%s5608_s1 + $0x744] ss:$16 sps:$4 sm:$0xff]  }
  0xaf   :  { %1933 = vmatpush1.bf16.msra.mxu0 %v4038_v60  ;;  %v4139_v60 = vld [vmem:[%s5608_s1 + $0x6cc] ss:$16 sps:$4 sm:$0xff]  }
  0xb0   :  { %2190 = vmatpush1.bf16.msra.mxu1 %v4041_v61  ;;  %1934 = vmatprep.subr.bf16.mxu0 %v4046_v62 }
  0xb1   :  { %2191 = vmatprep.subr.bf16.mxu1 %v4049_v63  ;;  %v4134_v63 = vld [vmem:[%s5608_s1 + $0x740] ss:$16 sps:$4 sm:$0xff]  }
  0xb3   :  { %1935 = vmatpush1.bf16.msra.mxu0 %v4044_v0  ;;  %v4137_v0 = vld [vmem:[%s5608_s1 + $0x6c8] ss:$16 sps:$4 sm:$0xff]  }
  0xb4   :  { %2192 = vmatpush1.bf16.msra.mxu1 %v4047_v2  ;;  %1936 = vmatprep.subr.bf16.mxu0 %v4052_v3  ;;  %v4142_v3 = vld [vmem:[%s5608_s1 + $0x764] ss:$16 sps:$4 sm:$0xff]  }
  0xb5   :  { %2193 = vmatprep.subr.bf16.mxu1 %v4055_v4  ;;  %v4145_v4 = vld [vmem:[%s5608_s1 + $0x6ec] ss:$16 sps:$4 sm:$0xff]  }
  0xb7   :  { %1937 = vmatpush1.bf16.msra.mxu0 %v4050_v5 }
  0xb8   :  { %2194 = vmatpush1.bf16.msra.mxu1 %v4053_v6  ;;  %1938 = vmatprep.subr.bf16.mxu0 %v4060_v7  ;;  %v4140_v6 = vld [vmem:[%s5608_s1 + $0x760] ss:$16 sps:$4 sm:$0xff]   ;;  %v4143_v7 = vld [vmem:[%s5608_s1 + $0x6e8] ss:$16 sps:$4 sm:$0xff]  }
  0xb9   :  { %2195 = vmatprep.subr.bf16.mxu1 %v4063_v8  ;;  %v4148_v8 = vld [vmem:[%s5608_s1 + $0x784] ss:$16 sps:$4 sm:$0xff]  }
  0xbb   :  { %1939 = vmatpush1.bf16.msra.mxu0 %v4058_v9  ;;  %v4151_v9 = vld [vmem:[%s5608_s1 + $0x70c] ss:$16 sps:$4 sm:$0xff]  }
  0xbc   :  { %2196 = vmatpush1.bf16.msra.mxu1 %v4061_v10  ;;  %1940 = vmatprep.subr.bf16.mxu0 %v4067_v11  ;;  %v4146_v10 = vld [vmem:[%s5608_s1 + $0x780] ss:$16 sps:$4 sm:$0xff]   ;;  %v4149_v11 = vld [vmem:[%s5608_s1 + $0x708] ss:$16 sps:$4 sm:$0xff]  }
  0xbd   :  { %2197 = vmatprep.subr.bf16.mxu1 %v4070_v12  ;;  %v4154_v12 = vld [vmem:[%s5608_s1 + $0x7a4] ss:$16 sps:$4 sm:$0xff]  }
  0xbf   :  { %1941 = vmatpush1.bf16.msra.mxu0 %v4065_v13  ;;  %v4157_v13 = vld [vmem:[%s5608_s1 + $0x72c] ss:$16 sps:$4 sm:$0xff]  }
  0xc0   :  { %2198 = vmatpush1.bf16.msra.mxu1 %v4068_v14  ;;  %1963 = vmatprep.subr.bf16.mxu0 %v4076_v15  ;;  %v4152_v14 = vld [vmem:[%s5608_s1 + $0x7a0] ss:$16 sps:$4 sm:$0xff]   ;;  %v4155_v15 = vld [vmem:[%s5608_s1 + $0x728] ss:$16 sps:$4 sm:$0xff]  }
  0xc1   :  { %2199 = vmatprep.subr.bf16.mxu1 %v4079_v16  ;;  %v4163_v16 = vld [vmem:[%s5608_s1 + $0x7c4] ss:$16 sps:$4 sm:$0xff]  }
  0xc2   :  { %1943 = vmatmul.mubr.bf16.vlgmr.msra.gmra.mrb[0].mxu0 %v4071_v17 }
  0xc3   :  { %1964 = vmatpush1.bf16.msra.mxu0 %v4074_v18  ;;  %1952 = vmatprep.mubr.bf16.mxu0 %v4158_v22  ;;  %v4161_v18 = vld [vmem:[%s5608_s1 + $0x7c0] ss:$16 sps:$4 sm:$0xff]  }
  0xc4   :  { %2200 = vmatpush1.bf16.msra.mxu1 %v4077_v19  ;;  %1965 = vmatprep.subr.bf16.mxu0 %v4082_v20  ;;  %v4164_v19 = vld [vmem:[%s5608_s1 + $0x748] ss:$16 sps:$4 sm:$0xff]   ;;  %v4169_v20 = vld [vmem:[%s5608_s1 + $0x7e4] ss:$16 sps:$4 sm:$0xff]  }
  0xc5   :  { %2201 = vmatprep.subr.bf16.mxu1 %v4085_v21  ;;  %v4172_v21 = vld [vmem:[%s5608_s1 + $0x76c] ss:$16 sps:$4 sm:$0xff]  }
  0xc7   :  { %1966 = vmatpush1.bf16.msra.mxu0 %v4080_v23  ;;  %v4170_v23 = vld [vmem:[%s5608_s1 + $0x768] ss:$16 sps:$4 sm:$0xff]  }
  0xc8   :  { %2202 = vmatpush1.bf16.msra.mxu1 %v4083_v24  ;;  %1967 = vmatprep.subr.bf16.mxu0 %v4088_v25  ;;  %v4178_v24 = vld [vmem:[%s5608_s1 + $0x78c] ss:$16 sps:$4 sm:$0xff]  }
  0xc9   :  { %2203 = vmatprep.subr.bf16.mxu1 %v4091_v26  ;;  %v4205_v25 = vld [vmem:[%s5610_s3 + $0x4] ss:$8 sps:$4 sm:$0xff]   ;;  %v4173_v26 = vld [vmem:[%s5609_s0 + $0x18] ss:$36 sps:$4 sm:$0xff]  }
  0xca   :  { %1953 = vmatmul.mubr.bf16.gmra.mrb[4].mxu0 %v4160_v27 }
  0xcb   :  { %1968 = vmatpush1.bf16.msra.mxu0 %v4086_v28  ;;  %1995 = vmatprep.mubr.bf16.mxu0 %v4175_v32  ;;  %v4182_v28 = vld [vmem:[%s5609_s0 + $0x64] ss:$36 sps:$4 sm:$0xff]  }
  0xcc   :  { %2204 = vmatpush1.bf16.msra.mxu1 %v4089_v29  ;;  %1969 = vmatprep.subr.bf16.mxu0 %v4094_v30  ;;  %v4181_v29 = vld [vmem:[%s5608_s1 + $0x7ac] ss:$16 sps:$4 sm:$0xff]   ;;  %v4203_v30 = vld [vmem:[%s5610_s3] ss:$8 sps:$4 sm:$0xff]  }
  0xcd   :  { %2205 = vmatprep.subr.bf16.mxu1 %v4097_v31  ;;  %v4208_v31 = vld [vmem:[%s5610_s3 + $0x14] ss:$8 sps:$4 sm:$0xff]  }
  0xcf   :  { %1970 = vmatpush1.bf16.msra.mxu0 %v4092_v33  ;;  %v4187_v33 = vld [vmem:[%s5608_s1 + $0x7cc] ss:$16 sps:$4 sm:$0xff]  }
  0xd0   :  { %2206 = vmatpush1.bf16.msra.mxu1 %v4095_v34  ;;  %1971 = vmatprep.subr.bf16.mxu0 %v4100_v35  ;;  %v4206_v34 = vld [vmem:[%s5610_s3 + $0x10] ss:$8 sps:$4 sm:$0xff]   ;;  %v4211_v35 = vld [vmem:[%s5610_s3 + $0x24] ss:$8 sps:$4 sm:$0xff]  }
  0xd1   :  { %2228 = vmatprep.subr.bf16.mxu1 %v4103_v36  ;;  %v4184_v36 = vld [vmem:[%s5609_s0 + $0x60] ss:$36 sps:$4 sm:$0xff]  }
  0xd3   :  { %2208 = vmatmul.mubr.bf16.vlgmr.msra.gmra.mrb[8].mxu1 %v4071_v17  ;;  %1972 = vmatpush1.bf16.msra.mxu0 %v4098_v37  ;;  %v4166_v17 = vld [vmem:[%s5608_s1 + $0x74c] ss:$16 sps:$4 sm:$0xff]   ;;  %v4185_v37 = vld [vmem:[%s5608_s1 + $0x7c8] ss:$16 sps:$4 sm:$0xff]  }
  0xd4   :  { %2229 = vmatpush1.bf16.msra.mxu1 %v4101_v38  ;;  %1973 = vmatprep.subr.bf16.mxu0 %v4106_v39  ;;  %v4190_v38 = vld [vmem:[%s5608_s1 + $0x7ec] ss:$16 sps:$4 sm:$0xff]   ;;  %v4209_v39 = vld [vmem:[%s5610_s3 + $0x20] ss:$8 sps:$4 sm:$0xff]  }
  0xd5   :  { %2230 = vmatprep.subr.bf16.mxu1 %v4109_v40  ;;  %2217 = vmatprep.mubr.bf16.mxu1 %v4158_v22  ;;  %v4167_v22 = vld [vmem:[%s5608_s1 + $0x7e0] ss:$16 sps:$4 sm:$0xff]  }
  0xd7   :  { %1974 = vmatpush1.bf16.msra.mxu0 %v4104_v41  ;;  %v4214_v41 = vld [vmem:[%s5610_s3 + $0x34] ss:$8 sps:$4 sm:$0xff]  }
  0xd8   :  { %2231 = vmatpush1.bf16.msra.mxu1 %v4107_v42  ;;  %1975 = vmatprep.subr.bf16.mxu0 %v4112_v43  ;;  %v4188_v43 = vld [vmem:[%s5608_s1 + $0x7e8] ss:$16 sps:$4 sm:$0xff]  }
  0xd9   :  { %2232 = vmatprep.subr.bf16.mxu1 %v4115_v44 }
  0xdb   :  { %2218 = vmatmul.mubr.bf16.gmra.mrb[12].mxu1 %v4160_v27  ;;  %1976 = vmatpush1.bf16.msra.mxu0 %v4110_v45  ;;  %v4176_v27 = vld [vmem:[%s5608_s1 + $0x788] ss:$16 sps:$4 sm:$0xff]   ;;  %v4193_v45 = vld [vmem:[%s5608_s1 + $0x80c] ss:$16 sps:$4 sm:$0xff]  }
  0xdc   :  { %2233 = vmatpush1.bf16.msra.mxu1 %v4113_v46  ;;  %1977 = vmatprep.subr.bf16.mxu0 %v4118_v47  ;;  %v4212_v47 = vld [vmem:[%s5610_s3 + $0x30] ss:$8 sps:$4 sm:$0xff]  }
  0xdd   :  { %2234 = vmatprep.subr.bf16.mxu1 %v4121_v48  ;;  %2260 = vmatprep.mubr.bf16.mxu1 %v4175_v32  ;;  %v4179_v32 = vld [vmem:[%s5608_s1 + $0x7a8] ss:$16 sps:$4 sm:$0xff]   ;;  %v4217_v48 = vld [vmem:[%s5610_s3 + $0x44] ss:$8 sps:$4 sm:$0xff]  }
  0xdf   :  { %1978 = vmatpush1.bf16.msra.mxu0 %v4116_v49  ;;  %v4191_v49 = vld [vmem:[%s5608_s1 + $0x808] ss:$16 sps:$4 sm:$0xff]  }
  0xe0   :  { %2235 = vmatpush1.bf16.msra.mxu1 %v4119_v50  ;;  %1979 = vmatprep.subr.bf16.mxu0 %v4124_v51  ;;  %v4196_v50 = vld [vmem:[%s5608_s1 + $0x82c] ss:$16 sps:$4 sm:$0xff]   ;;  %v4215_v51 = vld [vmem:[%s5610_s3 + $0x40] ss:$8 sps:$4 sm:$0xff]  }
  0xe1   :  { %2236 = vmatprep.subr.bf16.mxu1 %v4127_v52  ;;  %v4220_v52 = vld [vmem:[%s5610_s3 + $0x54] ss:$8 sps:$4 sm:$0xff]  }
  0xe3   :  { %1980 = vmatpush1.bf16.msra.mxu0 %v4122_v53  ;;  %v4194_v53 = vld [vmem:[%s5608_s1 + $0x828] ss:$16 sps:$4 sm:$0xff]  }
  0xe4   :  { %2237 = vmatpush1.bf16.msra.mxu1 %v4125_v54  ;;  %1981 = vmatprep.subr.bf16.mxu0 %v4130_v55  ;;  %v4199_v54 = vld [vmem:[%s5608_s1 + $0x84c] ss:$16 sps:$4 sm:$0xff]   ;;  %v4218_v55 = vld [vmem:[%s5610_s3 + $0x50] ss:$8 sps:$4 sm:$0xff]  }
  0xe5   :  { %2238 = vmatprep.subr.bf16.mxu1 %v4133_v56  ;;  %v4223_v56 = vld [vmem:[%s5610_s3 + $0x64] ss:$8 sps:$4 sm:$0xff]  }
  0xe6   :  { %v5143_v61 = vpop.f32.mrb[0].mxu1 }
  0xe7   :  { %v5145_v62 = vpop.f32.mrb[1].mxu1  ;;  %1982 = vmatpush1.bf16.msra.mxu0 %v4128_v57  ;;  %v4197_v57 = vld [vmem:[%s5608_s1 + $0x848] ss:$16 sps:$4 sm:$0xff]  }
  0xe8   :  { %2239 = vmatpush1.bf16.msra.mxu1 %v4131_v58  ;;  %v5153_v2 = vpop.f32.mrb[2].mxu1  ;;  %1983 = vmatprep.subr.bf16.mxu0 %v4136_v59  ;;  %v4202_v58 = vld [vmem:[%s5608_s1 + $0x86c] ss:$16 sps:$4 sm:$0xff]   ;;  %v4221_v59 = vld [vmem:[%s5610_s3 + $0x60] ss:$8 sps:$4 sm:$0xff]  }
  0xe9   :  { %2240 = vmatprep.subr.bf16.mxu1 %v4139_v60  ;;  %v5161_v5 = vpop.f32.mrb[3].mxu1  ;;  %v4226_v60 = vld [vmem:[%s5610_s3 + $0x74] ss:$8 sps:$4 sm:$0xff]  }
  0xeb   :  { %1984 = vmatpush1.bf16.msra.mxu0 %v4134_v63  ;;  %v4200_v63 = vld [vmem:[%s5608_s1 + $0x868] ss:$16 sps:$4 sm:$0xff]  }
  0xec   :  { %2241 = vmatpush1.bf16.msra.mxu1 %v4137_v0  ;;  %1985 = vmatprep.subr.bf16.mxu0 %v4142_v3  ;;  %v4224_v0 = vld [vmem:[%s5610_s3 + $0x70] ss:$8 sps:$4 sm:$0xff]   ;;  %v4229_v3 = vld [vmem:[%s5610_s3 + $0x84] ss:$8 sps:$4 sm:$0xff]  }
  0xed   :  { %2242 = vmatprep.subr.bf16.mxu1 %v4145_v4  ;;  %v4227_v4 = vld [vmem:[%s5610_s3 + $0x80] ss:$8 sps:$4 sm:$0xff]  }
  0xee   :  { %v5265_v40 = vpop.f32.mrb[4].mxu1 }
  0xef   :  { %1986 = vmatpush1.bf16.msra.mxu0 %v4140_v6  ;;  %v5270_v42 = vpop.f32.mrb[5].mxu1  ;;  %v4232_v6 = vld [vmem:[%s5610_s3 + $0x94] ss:$8 sps:$4 sm:$0xff]  }
  0xf0   :  { %2243 = vmatpush1.bf16.msra.mxu1 %v4143_v7  ;;  %1987 = vmatprep.subr.bf16.mxu0 %v4148_v8  ;;  %v5275_v44 = vpop.f32.mrb[6].mxu1  ;;  %v4339_v7 = vld [vmem:[%s5609_s0 + $0x20] ss:$36 sps:$4 sm:$0xff]   ;;  %v4230_v8 = vld [vmem:[%s5610_s3 + $0x90] ss:$8 sps:$4 sm:$0xff]  }
  0xf1   :  { %2244 = vmatprep.subr.bf16.mxu1 %v4151_v9  ;;  %v5280_v46 = vpop.f32.mrb[7].mxu1  ;;  %v4235_v9 = vld [vmem:[%s5610_s3 + $0xa4] ss:$8 sps:$4 sm:$0xff]  }
  0xf3   :  { %1988 = vmatpush1.bf16.msra.mxu0 %v4146_v10  ;;  %v4233_v10 = vld [vmem:[%s5610_s3 + $0xa0] ss:$8 sps:$4 sm:$0xff]  }
  0xf4   :  { %2245 = vmatpush1.bf16.msra.mxu1 %v4149_v11  ;;  %1989 = vmatprep.subr.bf16.mxu0 %v4154_v12  ;;  %v4340_v11 = vld [vmem:[%s5609_s0 + $0x68] ss:$36 sps:$4 sm:$0xff]   ;;  %v4236_v12 = vld [vmem:[%s5610_s3 + $0xb0] ss:$8 sps:$4 sm:$0xff]  }
  0xf5   :  { %2246 = vmatprep.subr.bf16.mxu1 %v4157_v13  ;;  %v4241_v13 = vld [vmem:[%s5610_s3 + $0xc4] ss:$8 sps:$4 sm:$0xff]  }
  0xf7   :  { %1990 = vmatpush1.bf16.msra.mxu0 %v4152_v14  ;;  %v4239_v14 = vld [vmem:[%s5610_s3 + $0xc0] ss:$8 sps:$4 sm:$0xff]  }
  0xf8   :  { %2247 = vmatpush1.bf16.msra.mxu1 %v4155_v15  ;;  %1991 = vmatprep.subr.bf16.mxu0 %v4163_v16  ;;  %v4244_v15 = vld [vmem:[%s5610_s3 + $0xd4] ss:$8 sps:$4 sm:$0xff]   ;;  %v4242_v16 = vld [vmem:[%s5610_s3 + $0xd0] ss:$8 sps:$4 sm:$0xff]  }
  0xf9   :  { %2248 = vmatprep.subr.bf16.mxu1 %v4166_v17  ;;  %v4247_v17 = vld [vmem:[%s5610_s3 + $0xe4] ss:$8 sps:$4 sm:$0xff]  }
  0xfb   :  { %1992 = vmatpush1.bf16.msra.mxu0 %v4161_v18  ;;  %v4245_v18 = vld [vmem:[%s5610_s3 + $0xe0] ss:$8 sps:$4 sm:$0xff]  }
  0xfc   :  { %2249 = vmatpush1.bf16.msra.mxu1 %v4164_v19  ;;  %1993 = vmatprep.subr.bf16.mxu0 %v4169_v20  ;;  %v4250_v19 = vld [vmem:[%s5610_s3 + $0xf4] ss:$8 sps:$4 sm:$0xff]   ;;  %v4248_v20 = vld [vmem:[%s5610_s3 + $0xf0] ss:$8 sps:$4 sm:$0xff]  }
  0xfd   :  { %2250 = vmatprep.subr.bf16.mxu1 %v4172_v21  ;;  %v4253_v21 = vld [vmem:[%s5610_s3 + $0x104] ss:$8 sps:$4 sm:$0xff]  }
  0xff   :  { %1994 = vmatpush1.bf16.msra.mxu0 %v4167_v22  ;;  %v4299_v22 = vld [vmem:[%s5611_s5 + $0x40] sm:$0xff]  }
 0x100   :  { %2251 = vmatpush1.bf16.msra.mxu1 %v4170_v23  ;;  %2754 = vmatprep.subr.bf16.mxu0 %v4205_v25  ;;  %v4300_v23 = vld [vmem:[%s5611_s5] sm:$0xff]   ;;  %v4302_v25 = vld [vmem:[%s5611_s5 + $0x8] sm:$0xff]  }
 0x101   :  { %2252 = vmatprep.subr.bf16.mxu1 %v4178_v24  ;;  %v4301_v24 = vld [vmem:[%s5611_s5 + $0x48] sm:$0xff]  }
 0x102   :  { %1996 = vmatmul.mubr.bf16.vlgmr.msra.gmra.mrb[0].mxu0 %v4173_v26 }
 0x103   :  { %2005 = vmatprep.mubr.bf16.mxu0 %v4182_v28  ;;  %2755 = vmatpush1.bf16.msra.mxu0 %v4203_v30  ;;  %v4307_v30 = vld [vmem:[%s5611_s5 + $0x60] sm:$0xff]  }
 0x104   :  { %2253 = vmatpush1.bf16.msra.mxu1 %v4176_v27  ;;  %2756 = vmatprep.subr.bf16.mxu0 %v4208_v31  ;;  %v4304_v27 = vld [vmem:[%s5611_s5 + $0x10] sm:$0xff]   ;;  %v4308_v31 = vld [vmem:[%s5611_s5 + $0x20] sm:$0xff]  }
 0x105   :  { %2254 = vmatprep.subr.bf16.mxu1 %v4181_v29  ;;  %v4306_v29 = vld [vmem:[%s5611_s5 + $0x18] sm:$0xff]  }
 0x107   :  { %2757 = vmatpush1.bf16.msra.mxu0 %v4206_v34 }
 0x108   :  { %2255 = vmatpush1.bf16.msra.mxu1 %v4179_v32  ;;  %2758 = vmatprep.subr.bf16.mxu0 %v4211_v35  ;;  %v4309_v32 = vld [vmem:[%s5611_s5 + $0x68] sm:$0xff]  }
 0x109   :  { %2256 = vmatprep.subr.bf16.mxu1 %v4187_v33  ;;  %v327_v33 = vlaneseq }
 0x10a   :  { %2006 = vmatmul.mubr.bf16.gmra.mrb[4].mxu0 %v4184_v36 }
 0x10b   :  { %2759 = vmatpush1.bf16.msra.mxu0 %v4209_v39  ;;  %v5424_v34 = vshrl.u32 %v327_v33, 7  ;;  %v4269_v33 = vld [vmem:[%s5610_s3 + $0x160] ss:$8 sps:$4 sm:$0xff]  }
 0x10c   :  { %2257 = vmatpush1.bf16.msra.mxu1 %v4185_v37  ;;  %2760 = vmatprep.subr.bf16.mxu0 %v4214_v41 }
 0x10d   :  { %2258 = vmatprep.subr.bf16.mxu1 %v4190_v38  ;;  %v329_v35 = vsub.s32 0, %v5424_v34  ;;  %v333_v37 = vsub.s32 1, %v5424_v34 }
 0x10f   :  { %2761 = vmatpush1.bf16.msra.mxu0 %v4212_v47 }
 0x110   :  { %2259 = vmatpush1.bf16.msra.mxu1 %v4188_v43  ;;  %2762 = vmatprep.subr.bf16.mxu0 %v4217_v48 }
 0x111   :  { %2281 = vmatprep.subr.bf16.mxu1 %v4193_v45 }
 0x113   :  { %2261 = vmatmul.mubr.bf16.vlgmr.msra.gmra.mrb[8].mxu1 %v4173_v26  ;;  %2763 = vmatpush1.bf16.msra.mxu0 %v4215_v51  ;;  %v4303_v26 = vld [vmem:[%s5611_s5 + $0x50] sm:$0xff]  }
 0x114   :  { %2282 = vmatpush1.bf16.msra.mxu1 %v4191_v49  ;;  %2270 = vmatprep.mubr.bf16.mxu1 %v4182_v28  ;;  %v4305_v28 = vld [vmem:[%s5611_s5 + $0x58] sm:$0xff]  }
 0x115   :  { %2283 = vmatprep.subr.bf16.mxu1 %v4196_v50  ;;  %2764 = vmatprep.subr.bf16.mxu0 %v4220_v52 }
 0x117   :  { %2765 = vmatpush1.bf16.msra.mxu0 %v4218_v55 }
 0x118   :  { %2284 = vmatpush1.bf16.msra.mxu1 %v4194_v53  ;;  %2766 = vmatprep.subr.bf16.mxu0 %v4223_v56 }
 0x119   :  { %2285 = vmatprep.subr.bf16.mxu1 %v4199_v54 }
 0x11b   :  { %2271 = vmatmul.mubr.bf16.gmra.mrb[12].mxu1 %v4184_v36  ;;  %2767 = vmatpush1.bf16.msra.mxu0 %v4221_v59  ;;  %v5430_v36 = vld [vmem:[%s5612_s2] sm:$0xf] }
 0x11c   :  { %2286 = vmatpush1.bf16.msra.mxu1 %v4197_v57  ;;  %2313 = vmatprep.mubr.bf16.mxu1 %v4341_v1  ;;  %v330_v38 = vrot.slane %v5430_v36, %v329_v35  ;;  %v334_v39 = vrot.slane %v5430_v36, %v333_v37 }
 0x11d   :  { %2287 = vmatprep.subr.bf16.mxu1 %v4202_v58  ;;  %2768 = vmatprep.subr.bf16.mxu0 %v4226_v60 }
 0x11f   :  { %2769 = vmatpush1.bf16.msra.mxu0 %v4224_v0 }
 0x120   :  { %2288 = vmatpush1.bf16.msra.mxu1 %v4200_v63  ;;  %2770 = vmatprep.subr.bf16.mxu0 %v4229_v3 }
 0x121   :  { %3614 = vmatprep.subr.bf16.mxu1 %v4299_v22  ;;  %v341_v22 = vsub.s32 3, %v5424_v34 }
 0x123   :  { %3522 = vmatmul.mubr.msk.bf16.vlgmr.msra.gmra.mrb[8].mxu1 %vm1797_vm0, %v4339_v7  ;;  %2771 = vmatpush1.bf16.msra.mxu0 %v4227_v4 }
 0x124   :  { %2323 = vmatprep.mubr.bf16.mxu1 %v4341_v1  ;;  %2772 = vmatprep.subr.bf16.mxu0 %v4232_v6  ;;  %v4238_v1 = vld [vmem:[%s5610_s3 + $0xb4] ss:$8 sps:$4 sm:$0xff]  }
 0x125   :  { %3615 = vmatpush3.bf16.msra.mxu1 %v4300_v23  ;;  %v4268_v23 = vld [vmem:[%s5610_s3 + $0x154] ss:$8 sps:$4 sm:$0xff]  }
 0x126   :  { %3616 = vmatprep.subr.bf16.mxu1 %v4301_v24 }
 0x127   :  { %2773 = vmatpush1.bf16.msra.mxu0 %v4230_v8 }
 0x128   :  { %2774 = vmatprep.subr.bf16.mxu0 %v4235_v9 }
 0x129   :  { %3617 = vmatpush3.bf16.msra.mxu1 %v4302_v25  ;;  %v4266_v25 = vld [vmem:[%s5610_s3 + $0x150] ss:$8 sps:$4 sm:$0xff]  }
 0x12a   :  { %3618 = vmatprep.subr.bf16.mxu1 %v4303_v26  ;;  %v342_v26 = vrot.slane %v5430_v36, %v341_v22 }
 0x12b   :  { %3523 = vmatmul.mubr.msk.bf16.gmra.mrb[12].mxu1 %vm1797_vm0, %v4340_v11  ;;  %2775 = vmatpush1.bf16.msra.mxu0 %v4233_v10 }
 0x12c   :  { %2776 = vmatprep.subr.bf16.mxu0 %v4238_v1 }
 0x12d   :  { %3619 = vmatpush3.bf16.msra.mxu1 %v4304_v27  ;;  %v4271_v27 = vld [vmem:[%s5610_s3 + $0x164] ss:$8 sps:$4 sm:$0xff]  }
 0x12e   :  { %3620 = vmatprep.subr.bf16.mxu1 %v4305_v28 }
 0x12f   :  { %2777 = vmatpush1.bf16.msra.mxu0 %v4236_v12 }
 0x130   :  { %2778 = vmatprep.subr.bf16.mxu0 %v4241_v13 }
 0x131   :  { %3621 = vmatpush3.bf16.msra.mxu1 %v4306_v29 }
 0x132   :  { %3622 = vmatprep.subr.bf16.mxu1 %v4307_v30 }
 0x133   :  { %2779 = vmatpush1.bf16.msra.mxu0 %v4239_v14  ;;  %v4259_v14 = vld [vmem:[%s5610_s3 + $0x124] ss:$8 sps:$4 sm:$0xff]  }
 0x134   :  { %2780 = vmatprep.subr.bf16.mxu0 %v4244_v15 }
 0x135   :  { %3623 = vmatpush3.bf16.msra.mxu1 %v4308_v31 }
 0x136   :  { %3624 = vmatprep.subr.bf16.mxu1 %v4309_v32 }
 0x137   :  { %2781 = vmatpush1.bf16.msra.mxu0 %v4242_v16 }
 0x138   :  { %2782 = vmatprep.subr.bf16.mxu0 %v4247_v17  ;;  %v4262_v17 = vld [vmem:[%s5610_s3 + $0x134] ss:$8 sps:$4 sm:$0xff]  }
 0x13b   :  { %2783 = vmatpush1.bf16.msra.mxu0 %v4245_v18  ;;  %v4260_v18 = vld [vmem:[%s5610_s3 + $0x130] ss:$8 sps:$4 sm:$0xff]  }
 0x13c   :  { %2784 = vmatprep.subr.bf16.mxu0 %v4250_v19  ;;  %v4265_v19 = vld [vmem:[%s5610_s3 + $0x144] ss:$8 sps:$4 sm:$0xff]  }
 0x13f   :  { %2785 = vmatpush1.bf16.msra.mxu0 %v4248_v20  ;;  %v337_v20 = vsub.s32 2, %v5424_v34  ;;  %v4316_v34 = vld [vmem:[%s5613_s7 + $0x8] sm:$0xff]  }
 0x140   :  { %2807 = vmatprep.subr.bf16.mxu0 %v4253_v21  ;;  %v4263_v21 = vld [vmem:[%s5610_s3 + $0x140] ss:$8 sps:$4 sm:$0xff]  }
 0x141   :  { %v338_v24 = vrot.slane %v5430_v36, %v337_v20  ;;  %v4274_v36 = vld [vmem:[%s5610_s3 + $0x174] ss:$8 sps:$4 sm:$0xff]   ;;  %v2422_v20 = vld [vmem:[%s5614_s4] sm:$0x3] }
 0x142   :  { %v2431_v22 = vrot.slane %v2422_v20, %v333_v37 }
 0x1d5   :  { %v1997_v41 = vpop.f32.mrb[0].mxu0 }
 0x1d6   :  { %v3672_v43 = vadd.f32 %v1997_v41, %v330_v38  ;;  %v1999_v45 = vpop.f32.mrb[1].mxu0 }
 0x1d7   :  { %v3674_v47 = vadd.f32 %v1999_v45, %v334_v39  ;;  %v2001_v48 = vpop.f32.mrb[2].mxu0 }
 0x1d8   :  { %v3673_v49 = vadd.f32 %v3672_v43, %v5143_v61  ;;  %v3676_v50 = vadd.f32 %v2001_v48, %v330_v38  ;;  %v2003_v51 = vpop.f32.mrb[3].mxu0 }
 0x1d9   :  { %v3675_v52 = vadd.f32 %v3674_v47, %v5145_v62  ;;  %v3678_v53 = vadd.f32 %v2003_v51, %v334_v39  ;;  %v4251_v62 = vld [vmem:[%s5610_s3 + $0x100] ss:$8 sps:$4 sm:$0xff]   ;;  %v4277_v51 = vld [vmem:[%s5610_s3 + $0x184] ss:$8 sps:$4 sm:$0xff]  }
 0x1da   :  { %v3677_v54 = vadd.f32 %v3676_v50, %v5153_v2  ;;  %v2334_v56 = vmax.f32 %v3673_v49, 0.0  ;;  %v4272_v49 = vld [vmem:[%s5610_s3 + $0x170] ss:$8 sps:$4 sm:$0xff]  }
 0x1db   :  { %v3679_v55 = vadd.f32 %v3678_v53, %v5161_v5  ;;  %v2335_v58 = vmax.f32 %v3675_v52, 0.0  ;;  %v4256_v5 = vld [vmem:[%s5610_s3 + $0x114] ss:$8 sps:$4 sm:$0xff]  }
 0x1dc   :  { %v2338_v57 = vmax.f32 %v3677_v54, 0.0 }
 0x1dd   :  { %v2339_v59 = vmax.f32 %v3679_v55, 0.0  ;;  %v2007_v60 = vpop.f32.mrb[4].mxu0 }
 0x1de   :  { %v2350_v63 = vpack.c.bf16 %v2338_v57, %v2334_v56  ;;  %v3680_v0 = vadd.f32 %v2007_v60, %v330_v38  ;;  %v2009_v3 = vpop.f32.mrb[5].mxu0 }
 0x1df   :  { %v3682_v4 = vadd.f32 %v2009_v3, %v334_v39  ;;  %v2011_v6 = vpop.f32.mrb[6].mxu0  ;;  %v2351_v61 = vpack.c.bf16 %v2339_v59, %v2335_v58  ;;  %v4275_v58 = vld [vmem:[%s5610_s3 + $0x180] ss:$8 sps:$4 sm:$0xff]  }
 0x1e0   :  { %v3681_v7 = vadd.f32 %v3680_v0, %v5265_v40  ;;  %v3684_v2 = vadd.f32 %v2011_v6, %v330_v38  ;;  %v2013_v8 = vpop.f32.mrb[7].mxu0  ;;  %v4254_v40 = vld [vmem:[%s5610_s3 + $0x110] ss:$8 sps:$4 sm:$0xff]  }
 0x1e1   :  { %v3683_v9 = vadd.f32 %v3682_v4, %v5270_v42  ;;  %v3686_v10 = vadd.f32 %v2013_v8, %v334_v39  ;;  %2786 = vmatprep.mubr.bf16.mxu0 %v2351_v61 }
 0x1e2   :  { %v3685_v1 = vadd.f32 %v3684_v2, %v5275_v44  ;;  %2787 = vmatmul.mubr.bf16.vlgmr.msra.gmra.mrb[8].mxu0 %v2350_v63  ;;  %v2342_v12 = vmax.f32 %v3681_v7, 0.0  ;;  %v4280_v63 = vld [vmem:[%s5610_s3 + $0x194] ss:$8 sps:$4 sm:$0xff]   ;;  %v4283_v2 = vld [vmem:[%s5610_s3 + $0x1a4] ss:$8 sps:$4 sm:$0xff]  }
 0x1e3   :  { %v3687_v11 = vadd.f32 %v3686_v10, %v5280_v46  ;;  %2808 = vmatpush1.bf16.msra.mxu0 %v4251_v62  ;;  %v2343_v42 = vmax.f32 %v3683_v9, 0.0  ;;  %v4257_v46 = vld [vmem:[%s5610_s3 + $0x120] ss:$8 sps:$4 sm:$0xff]   ;;  %v4278_v62 = vld [vmem:[%s5610_s3 + $0x190] ss:$8 sps:$4 sm:$0xff]  }
 0x1e4   :  { %v2346_v13 = vmax.f32 %v3685_v1, 0.0  ;;  %2809 = vmatprep.subr.bf16.mxu0 %v4256_v5  ;;  %v4281_v5 = vld [vmem:[%s5610_s3 + $0x1a0] ss:$8 sps:$4 sm:$0xff]   ;;  %v4286_v9 = vld [vmem:[%s5610_s3 + $0x1b4] ss:$8 sps:$4 sm:$0xff]  }
 0x1e5   :  { %v2347_v15 = vmax.f32 %v3687_v11, 0.0  ;;  %v4284_v10 = vld [vmem:[%s5610_s3 + $0x1b0] ss:$8 sps:$4 sm:$0xff]   ;;  %v4289_v1 = vld [vmem:[%s5610_s3 + $0x1c4] ss:$8 sps:$4 sm:$0xff]  }
 0x1e6   :  { %v2354_v16 = vpack.c.bf16 %v2346_v13, %v2342_v12  ;;  %v4287_v11 = vld [vmem:[%s5610_s3 + $0x1c0] ss:$8 sps:$4 sm:$0xff]   ;;  %v4290_v12 = vld [vmem:[%s5610_s3 + $0x1d0] ss:$8 sps:$4 sm:$0xff]   ;;  %v4295_v13 = vld [vmem:[%s5610_s3 + $0x1e4] ss:$8 sps:$4 sm:$0xff]  }
 0x1e7   :  { %2810 = vmatpush1.bf16.msra.mxu0 %v4254_v40  ;;  %v2355_v44 = vpack.c.bf16 %v2347_v15, %v2343_v42  ;;  %v4292_v40 = vld [vmem:[%s5610_s3 + $0x1d4] ss:$8 sps:$4 sm:$0xff]   ;;  %v4296_v15 = vld [vmem:[%s5610_s3 + $0x1f0] ss:$8 sps:$4 sm:$0xff]  }
 0x1e8   :  { %2811 = vmatprep.subr.bf16.mxu0 %v4259_v14  ;;  %v4293_v14 = vld [vmem:[%s5610_s3 + $0x1e0] ss:$8 sps:$4 sm:$0xff]   ;;  %v4298_v42 = vld [vmem:[%s5610_s3 + $0x1f4] ss:$8 sps:$4 sm:$0xff]  }
 0x1e9   :  { %2796 = vmatprep.mubr.bf16.mxu0 %v2355_v44  ;;  %v4311_v44 = vld [vmem:[%s5611_s5 + $0x70] sm:$0xff]  }
 0x1ea   :  { %2797 = vmatmul.mubr.bf16.gmra.mrb[12].mxu0 %v2354_v16  ;;  %v4310_v16 = vld [vmem:[%s5611_s5 + $0x28] sm:$0xff]  }
 0x1eb   :  { %2812 = vmatpush1.bf16.msra.mxu0 %v4257_v46  ;;  %3625 = vmatpush3.bf16.msra.mxu1 %v4310_v16  ;;  %v4312_v46 = vld [vmem:[%s5611_s5 + $0x30] sm:$0xff]  }
 0x1ec   :  { %2813 = vmatprep.subr.bf16.mxu0 %v4262_v17  ;;  %3626 = vmatprep.subr.bf16.mxu1 %v4311_v44  ;;  %v4313_v17 = vld [vmem:[%s5611_s5 + $0x78] sm:$0xff]  }
 0x1ef   :  { %2814 = vmatpush1.bf16.msra.mxu0 %v4260_v18  ;;  %3627 = vmatpush3.bf16.msra.mxu1 %v4312_v46  ;;  %v4314_v18 = vld [vmem:[%s5611_s5 + $0x38] sm:$0xff]  }
 0x1f0   :  { %2815 = vmatprep.subr.bf16.mxu0 %v4265_v19  ;;  %3628 = vmatprep.subr.bf16.mxu1 %v4313_v17  ;;  %v4315_v19 = vld [vmem:[%s5613_s7] sm:$0xff]  }
 0x1f1   :  { %v3605_v17 = vld [vmem:[%s5616_s8] ss:$0 sm:$0xff] }
 0x1f3   :  { %2816 = vmatpush1.bf16.msra.mxu0 %v4263_v21  ;;  %3629 = vmatpush3.bf16.msra.mxu1 %v4314_v18  ;;  %v2427_v21 = vrot.slane %v2422_v20, %v329_v35 }
 0x1f4   :  { %2817 = vmatprep.subr.bf16.mxu0 %v4268_v23  ;;  %3652 = vmatprep.subr.bf16.mxu1 %v4315_v19 }
 0x1f6   :  { %v2315_v28 = vpop.f32.mrb[8].mxu1 }
 0x1f7   :  { %v3688_v29 = vadd.f32 %v2315_v28, %v338_v24  ;;  %v2317_v30 = vpop.f32.mrb[9].mxu1  ;;  %2818 = vmatpush1.bf16.msra.mxu0 %v4266_v25 }
 0x1f8   :  { %v3689_v31 = vadd.f32 %v2317_v30, %v342_v26  ;;  %v2319_v32 = vpop.f32.mrb[10].mxu1  ;;  %2819 = vmatprep.subr.bf16.mxu0 %v4271_v27 }
 0x1f9   :  { %v3690_v38 = vadd.f32 %v2319_v32, %v338_v24  ;;  %v2321_v39 = vpop.f32.mrb[11].mxu1  ;;  %v2336_v43 = vmax.f32 %v3688_v29, 0.0 }
 0x1fa   :  { %v3691_v41 = vadd.f32 %v2321_v39, %v342_v26  ;;  %v2337_v47 = vmax.f32 %v3689_v31, 0.0 }
 0x1fb   :  { %v2340_v45 = vmax.f32 %v3690_v38, 0.0  ;;  %2820 = vmatpush1.bf16.msra.mxu0 %v4269_v33 }
 0x1fc   :  { %v2341_v48 = vmax.f32 %v3691_v41, 0.0  ;;  %2821 = vmatprep.subr.bf16.mxu0 %v4274_v36 }
 0x1fd   :  { %v2352_v50 = vpack.c.bf16 %v2340_v45, %v2336_v43 }
 0x1fe   :  { %v2353_v52 = vpack.c.bf16 %v2341_v48, %v2337_v47  ;;  %v2325_v53 = vpop.f32.mrb[12].mxu1 }
 0x1ff   :  { %v3692_v54 = vadd.f32 %v2325_v53, %v338_v24  ;;  %v2327_v55 = vpop.f32.mrb[13].mxu1  ;;  %2822 = vmatpush1.bf16.msra.mxu0 %v4272_v49 }
 0x200   :  { %v3693_v56 = vadd.f32 %v2327_v55, %v342_v26  ;;  %v2329_v57 = vpop.f32.mrb[14].mxu1  ;;  %2839 = vmatprep.mubr.bf16.mxu0 %v2353_v52  ;;  %2823 = vmatprep.subr.bf16.mxu0 %v4277_v51  ;;  %v4317_v52 = vld [vmem:[%s5613_s7 + $0x10] sm:$0xff]  }
 0x201   :  { %v3694_v59 = vadd.f32 %v2329_v57, %v338_v24  ;;  %v2331_v60 = vpop.f32.mrb[15].mxu1  ;;  %v2344_v3 = vmax.f32 %v3692_v54, 0.0  ;;  %v4318_v57 = vld [vmem:[%s5613_s7 + $0x18] sm:$0xff]  }
 0x202   :  { %v3695_v0 = vadd.f32 %v2331_v60, %v342_v26  ;;  %v2345_v6 = vmax.f32 %v3693_v56, 0.0  ;;  %v4321_v60 = vld [vmem:[%s5613_s7 + $0x30] sm:$0xff]  }
 0x203   :  { %v2348_v4 = vmax.f32 %v3694_v59, 0.0  ;;  %2824 = vmatpush1.bf16.msra.mxu0 %v4275_v58  ;;  %v4319_v58 = vld [vmem:[%s5613_s7 + $0x20] sm:$0xff]   ;;  %v4320_v59 = vld [vmem:[%s5613_s7 + $0x28] sm:$0xff]  }
 0x204   :  { %v2349_v61 = vmax.f32 %v3695_v0, 0.0  ;;  %2825 = vmatprep.subr.bf16.mxu0 %v4280_v63  ;;  %v4322_v63 = vld [vmem:[%s5613_s7 + $0x38] sm:$0xff]  }
 0x205   :  { %v2356_v7 = vpack.c.bf16 %v2348_v4, %v2344_v3  ;;  %v3588_v3 = vld [vmem:[%s5615_s6] ss:$0 sm:$0xff] }
 0x206   :  { %v2357_v8 = vpack.c.bf16 %v2349_v61, %v2345_v6 }
 0x207   :  { %2826 = vmatpush1.bf16.msra.mxu0 %v4278_v62 }
 0x208   :  { %2827 = vmatprep.subr.bf16.mxu0 %v4283_v2 }
 0x20b   :  { %2828 = vmatpush1.bf16.msra.mxu0 %v4281_v5 }
 0x20c   :  { %2829 = vmatprep.subr.bf16.mxu0 %v4286_v9 }
 0x20f   :  { %2830 = vmatpush1.bf16.msra.mxu0 %v4284_v10 }
 0x210   :  { %2831 = vmatprep.subr.bf16.mxu0 %v4289_v1 }
 0x213   :  { %2832 = vmatpush1.bf16.msra.mxu0 %v4287_v11 }
 0x214   :  { %2833 = vmatprep.subr.bf16.mxu0 %v4292_v40 }
 0x217   :  { %2834 = vmatpush1.bf16.msra.mxu0 %v4290_v12 }
 0x218   :  { %2835 = vmatprep.subr.bf16.mxu0 %v4295_v13 }
 0x21b   :  { %2836 = vmatpush1.bf16.msra.mxu0 %v4293_v14 }
 0x21c   :  { %2837 = vmatprep.subr.bf16.mxu0 %v4298_v42 }
 0x21f   :  { %2838 = vmatpush1.bf16.msra.mxu0 %v4296_v15 }
 0x222   :  { %2840 = vmatmul.mubr.bf16.vlgmr.msra.gmra.mrb[8].mxu0 %v2352_v50 }
 0x223   :  { %2849 = vmatprep.mubr.bf16.mxu0 %v2357_v8 }
 0x22a   :  { %2850 = vmatmul.mubr.bf16.gmra.mrb[12].mxu0 %v2356_v7 }
 0x2f5   :  { %v2841_v23 = vpop.f32.mrb[8].mxu0 }
 0x2f6   :  { %v3696_v24 = vadd.f32 %v2841_v23, %v2427_v21  ;;  %v2843_v25 = vpop.f32.mrb[9].mxu0 }
 0x2f7   :  { %v3697_v26 = vadd.f32 %v2843_v25, %v2431_v22  ;;  %v2845_v27 = vpop.f32.mrb[10].mxu0 }
 0x2f8   :  { %v3698_v28 = vadd.f32 %v2845_v27, %v2427_v21  ;;  %v2847_v29 = vpop.f32.mrb[11].mxu0  ;;  %v2860_v31 = vmax.f32 %v3696_v24, 0.0 }
 0x2f9   :  { %v3699_v30 = vadd.f32 %v2847_v29, %v2431_v22  ;;  %v2861_v33 = vmax.f32 %v3697_v26, 0.0 }
 0x2fa   :  { %v2862_v32 = vmax.f32 %v3698_v28, 0.0 }
 0x2fb   :  { %v2863_v38 = vmax.f32 %v3699_v30, 0.0 }
 0x2fc   :  { %v2868_v39 = vpack.c.bf16 %v2862_v32, %v2860_v31 }
 0x2fd   :  { %v2869_v36 = vpack.c.bf16 %v2863_v38, %v2861_v33  ;;  %v2851_v41 = vpop.f32.mrb[12].mxu0 }
 0x2fe   :  { %v3700_v43 = vadd.f32 %v2851_v41, %v2427_v21  ;;  %v2853_v35 = vpop.f32.mrb[13].mxu0 }
 0x2ff   :  { %v3701_v37 = vadd.f32 %v2853_v35, %v2431_v22  ;;  %v2855_v45 = vpop.f32.mrb[14].mxu0  ;;  %3039 = vmatprep.mubr.bf16.mxu1 %v2869_v36 }
 0x300   :  { %v3702_v47 = vadd.f32 %v2855_v45, %v2427_v21  ;;  %v2857_v48 = vpop.f32.mrb[15].mxu0  ;;  %3040 = vmatmul.mubr.bf16.vlgmr.msra.gmra.mrb[16].mxu1 %v2868_v39  ;;  %v2864_v50 = vmax.f32 %v3700_v43, 0.0 }
 0x301   :  { %v3703_v49 = vadd.f32 %v2857_v48, %v2431_v22  ;;  %3653 = vmatpush3.bf16.msra.mxu1 %v4315_v19  ;;  %v2865_v53 = vmax.f32 %v3701_v37, 0.0 }
 0x302   :  { %v2866_v51 = vmax.f32 %v3702_v47, 0.0  ;;  %3654 = vmatprep.subr.bf16.mxu1 %v4316_v34 }
 0x303   :  { %v2867_v54 = vmax.f32 %v3703_v49, 0.0 }
 0x304   :  { %v2870_v55 = vpack.c.bf16 %v2866_v51, %v2864_v50 }
 0x305   :  { %v2871_v56 = vpack.c.bf16 %v2867_v54, %v2865_v53  ;;  %3655 = vmatpush3.bf16.msra.mxu1 %v4316_v34 }
 0x306   :  { %3656 = vmatprep.subr.bf16.mxu1 %v4317_v52 }
 0x307   :  { %3047 = vmatprep.mubr.bf16.mxu1 %v2871_v56 }
 0x308   :  { %3048 = vmatmul.mubr.bf16.gmra.mrb[20].mxu1 %v2870_v55 }
 0x309   :  { %3657 = vmatpush3.bf16.msra.mxu1 %v4317_v52 }
 0x30a   :  { %3658 = vmatprep.subr.bf16.mxu1 %v4318_v57 }
 0x30d   :  { %3659 = vmatpush3.bf16.msra.mxu1 %v4318_v57 }
 0x30e   :  { %3660 = vmatprep.subr.bf16.mxu1 %v4319_v58 }
 0x311   :  { %3661 = vmatpush3.bf16.msra.mxu1 %v4319_v58 }
 0x312   :  { %3662 = vmatprep.subr.bf16.mxu1 %v4320_v59 }
 0x315   :  { %3663 = vmatpush3.bf16.msra.mxu1 %v4320_v59 }
 0x316   :  { %3664 = vmatprep.subr.bf16.mxu1 %v4321_v60 }
 0x319   :  { %3665 = vmatpush3.bf16.msra.mxu1 %v4321_v60 }
 0x31a   :  { %3666 = vmatprep.subr.bf16.mxu1 %v4322_v63 }
 0x31d   :  { %3667 = vmatpush3.bf16.msra.mxu1 %v4322_v63 }
 0x3d3   :  { %v3630_v0 = vpop.f32.mrb[16].mxu1 }
 0x3d4   :  { %v3631_v4 = vpop.f32.mrb[17].mxu1 }
 0x3d5   :  { %v3632_v6 = vadd.f32 %v3631_v4, %v3630_v0  ;;  %v3633_v61 = vpop.f32.mrb[18].mxu1 }
 0x3d6   :  { %v3634_v62 = vpop.f32.mrb[19].mxu1 }
 0x3d7   :  { %v3042_v7 = vadd.f32 %v3632_v6, %v3588_v3  ;;  %v3635_v2 = vadd.f32 %v3634_v62, %v3633_v61 }
 0x3d9   :  { %v3045_v8 = vadd.f32 %v3635_v2, %v3588_v3  ;;  %v3056_v5 = vmax.f32 %v3042_v7, 0.0 }
 0x3db   :  { %v3057_v9 = vmax.f32 %v3045_v8, 0.0  ;;  %v3636_v10 = vpop.f32.mrb[20].mxu1 }
 0x3dc   :  { %v3637_v1 = vpop.f32.mrb[21].mxu1 }
 0x3dd   :  { %v3638_v11 = vadd.f32 %v3637_v1, %v3636_v10  ;;  %v3639_v40 = vpop.f32.mrb[22].mxu1  ;;  %v3060_v12 = vpack.c.bf16 %v3057_v9, %v3056_v5 }
 0x3de   :  { %v3640_v13 = vpop.f32.mrb[23].mxu1 }
 0x3df   :  { %v3050_v14 = vadd.f32 %v3638_v11, %v3588_v3  ;;  %v3641_v42 = vadd.f32 %v3640_v13, %v3639_v40  ;;  %3668 = vmatprep.mubr.bf16.mxu1 %v3060_v12 }
 0x3e1   :  { %v3053_v15 = vadd.f32 %v3641_v42, %v3588_v3  ;;  %v3058_v16 = vmax.f32 %v3050_v14, 0.0 }
 0x3e3   :  { %v3059_v44 = vmax.f32 %v3053_v15, 0.0 }
 0x3e5   :  { %v3061_v46 = vpack.c.bf16 %v3059_v44, %v3058_v16 }
 0x3e7   :  { %3669 = vmatmul.mubr.bf16.vlgmr.msra.gmra.mrb[24].mxu1 %v3061_v46 }
 0x4ba   :  { %v3670_v18 = vpop.f32.mrb[24].mxu1 }
 0x4bb   :  { %v3176_v19 = vadd.f32 %v3670_v18, %v3605_v17  ;;  %v3167_v20 = vpop.f32.mrb[25].mxu1 }
 0x4bc   :  { %v3168_v21 = vadd.f32 %v3605_v17, %v3167_v20  ;;  %v3671_v22 = vpop.f32.mrb[26].mxu1 }
 0x4bd   :  { %3186 = vmax.xlane.f32.xlu1 %v3176_v19  ;;  %v3170_v23 = vpop.f32.mrb[27].mxu1  ;;  %v3179_v24 = vadd.f32 %v3671_v22, %v3605_v17 }
 0x4be   :  { %3182 = vmax.xlane.f32.xlu0 %v3168_v21  ;;  %v3171_v25 = vadd.f32 %v3605_v17, %v3170_v23 }
 0x4c1   :  { %3188 = vmax.xlane.f32.xlu1 %v3179_v24 }
 0x4c2   :  { %3184 = vmax.xlane.f32.xlu0 %v3171_v25 }
 0x54a   :  { %v3187_v26 = vpop.xlane.xlu1 %3186 }
 0x54b   :  { %v3192_v27 = vsub.f32 %v3176_v19, %v3187_v26  ;;  %v3183_v28 = vpop.xlane.xlu0 %3182 }
 0x54c   :  { %v3190_v29 = vsub.f32 %v3168_v21, %v3183_v28 }
 0x54d   :  { %v3198_v32 = vmul.f32 1.442695, %v3192_v27 }
 0x54e   :  { %v3194_v30 = vmul.f32 1.442695, %v3190_v29  ;;  %v3189_v31 = vpop.xlane.xlu1 %3188 }
 0x54f   :  { %v3185_v33 = vpop.xlane.xlu0 %3184  ;;  %v3193_v38 = vsub.f32 %v3179_v24, %v3189_v31 }
 0x550   :  { %4323 = vpow2.f32 %v3194_v30  ;;  %v3191_v39 = vsub.f32 %v3171_v25, %v3185_v33 }
 0x551   :  { %4325 = vpow2.f32 %v3198_v32  ;;  %v3200_v41 = vmul.f32 1.442695, %v3193_v38 }
 0x552   :  { %v3196_v36 = vmul.f32 1.442695, %v3191_v39 }
 0x554   :  { %4327 = vpow2.f32 %v3196_v36 }
 0x555   :  { %4329 = vpow2.f32 %v3200_v41 }
 0x55a   :  { %v4324_v43 = vpop.eup %4323 }
 0x55b   :  { %3202 = vadd.xlane.f32.xlu0 %v4324_v43  ;;  %v4326_v35 = vpop.eup %4325 }
 0x55e   :  { %v4328_v34 = vpop.eup %4327 }
 0x55f   :  { %3206 = vadd.xlane.f32.xlu0 %v4326_v35  ;;  %3204 = vadd.xlane.f32.xlu1 %v4328_v34  ;;  %v4330_v37 = vpop.eup %4329 }
 0x563   :  { %3208 = vadd.xlane.f32.xlu1 %v4330_v37 }
 0x5e8   :  { %v3203_v45 = vpop.xlane.xlu0 %3202 }
 0x5e9   :  { %4331 = vlog2.f32 %v3203_v45 }
 0x5ec   :  { %v3205_v47 = vpop.xlane.xlu1 %3204  ;;  %v3207_v48 = vpop.xlane.xlu0 %3206 }
 0x5ed   :  { %4333 = vlog2.f32 %v3205_v47 }
 0x5ee   :  { %4335 = vlog2.f32 %v3207_v48 }
 0x5f0   :  { %v3209_v49 = vpop.xlane.xlu1 %3208 }
 0x5f1   :  { %4337 = vlog2.f32 %v3209_v49 }
 0x5f3   :  { %v4332_v50 = vpop.eup %4331 }
 0x5f4   :  { %v3211_v51 = vmul.f32 0.6931472, %v4332_v50 }
 0x5f6   :  { %v3218_v52 = vsub.f32 %v3190_v29, %v3211_v51 }
 0x5f7   :  { %v4334_v53 = vpop.eup %4333 }
 0x5f8   :  { %v4336_v54 = vpop.eup %4335  ;;  %3222 = vst [vmem:[%s5617_s9] sm:$0xff] %v3218_v52  ;;  %v3213_v55 = vmul.f32 0.6931472, %v4334_v53 }
 0x5f9   :  { %v3215_v56 = vmul.f32 0.6931472, %v4336_v54 }
 0x5fa   :  { %v3219_v57 = vsub.f32 %v3191_v39, %v3213_v55 }
 0x5fb   :  { %v4338_v58 = vpop.eup %4337  ;;  %v3220_v59 = vsub.f32 %v3192_v27, %v3215_v56 }
 0x5fc   :  { %3223 = vst [vmem:[%s5617_s9 + $0x8] sm:$0xff] %v3219_v57  ;;  %v3217_v60 = vmul.f32 0.6931472, %v4338_v58 }
 0x5fd   :  { %3224 = vst [vmem:[%s5617_s9 + $0x10] sm:$0xff] %v3220_v59 }
 0x5fe   :  { %v3221_v63 = vsub.f32 %v3193_v38, %v3217_v60 }
 0x600   :  { %3225 = vst [vmem:[%s5617_s9 + $0x18] sm:$0xff] %v3221_v63 }

</bundles_post_ra>
